<compile_context>
chip_gen: v7x
topology: tpu7x:2x2x1
jax: 0.10.0
libtpu: 0.0.40
codegen_flags: <defaults>
</compile_context>

<pallas_src>
import functools

import jax
import jax.numpy as jnp
from jax.experimental import pallas as pl
from jax.experimental.pallas import tpu as pltpu

LANE = 128          # TPU lane width
BLOCK_M = 128       # node row-block (MXU-shaped)
NEG_BIG = -1e30     # masked-max sentinel (finite: avoids inf*0 NaNs downstream)


def _round_up(x, m):
    return ((x + m - 1) // m) * m


def _pad2(a, rows, cols):
    r, c = a.shape
    return jnp.pad(a, ((0, rows - r), (0, cols - c)))


# ---------------------------------------------------------------------------
# Kernels
# ---------------------------------------------------------------------------
def gcn_layer_kernel(adj_ref, h_ref, w_ref, b_ref, out_ref, *, relu):
    """One GCNConv layer for a block of output nodes.

    adj_ref: [TM, Npad]  bf16   row block of normalized adjacency Â
    h_ref:   [Npad, Cin] bf16   full node features (resident across grid steps)
    w_ref:   [Cin, Cout] bf16   dense weight
    b_ref:   [1, Cout]   f32    bias
    out_ref: [TM, Cout]  bf16
    """
    # (Â @ H) @ W : aggregate the row block against all nodes, then apply the
    # feature transform per row block. Both matmuls hit the MXU in bf16.
    ah = jnp.dot(adj_ref[...], h_ref[...], preferred_element_type=jnp.float32)
    y = jnp.dot(ah.astype(jnp.bfloat16), w_ref[...],
                preferred_element_type=jnp.float32)
    y = y + b_ref[...]
    if relu:
        y = jnp.maximum(y, 0.0)
    out_ref[...] = y.astype(out_ref.dtype)


def pool_linear_kernel(h_ref, bias_ref, wl_ref, bl_ref, out_ref, pooled_ref):
    """global_max_pool (per graph) + dropout(eval)=identity + final Linear.

    h_ref:      [TM, H]  bf16   layer-3 node features (row block)
    bias_ref:   [G, TM]  f32    additive mask (0 if node in graph g else -1e30)
    wl_ref:     [H, C]   bf16
    bl_ref:     [1, C]   f32
    out_ref:    [G, C]   f32    logits
    pooled_ref: [G, H]   f32    running per-graph max (VMEM scratch accumulator)
    """
    i = pl.program_id(0)

    @pl.when(i == 0)
    def _init():
        pooled_ref[...] = jnp.full_like(pooled_ref, NEG_BIG)

    h = h_ref[...].astype(jnp.float32)                         # [TM, H]
    bias = bias_ref[...]                                       # [G, TM]
    # Vectorized masked max over this node block (no per-graph Python loop).
    cand = jnp.max(bias[:, :, None] + h[None, :, :], axis=1)   # [G, H]
    pooled_ref[...] = jnp.maximum(pooled_ref[...], cand)

    @pl.when(i == pl.num_programs(0) - 1)
    def _finalize():
        logits = jnp.dot(pooled_ref[...].astype(jnp.bfloat16), wl_ref[...],
                         preferred_element_type=jnp.float32) + bl_ref[...]
        out_ref[...] = logits


# ---------------------------------------------------------------------------
# Pallas-call wrappers
# ---------------------------------------------------------------------------
def _vmem_limit(block_bytes):
    return int(min(max(4 * block_bytes, 16 * 1024 * 1024), 48 * 1024 * 1024))


def _gcn_conv(adj, h, w, b, *, relu, block_m=BLOCK_M):
    n = adj.shape[0]
    cin = h.shape[1]
    cout = w.shape[1]
    grid = (pl.cdiv(n, block_m),)

    block_bytes = (block_m * n * 2 + n * cin * 2 + cin * cout * 2
                   + cout * 4 + block_m * cout * 2)
    cost = pl.CostEstimate(
        flops=2 * n * n * cin + 2 * n * cin * cout,
        transcendentals=0,
        bytes_accessed=n * n * 2 + n * cin * 2 + cin * cout * 2
                       + cout * 4 + n * cout * 2)

    return pl.pallas_call(
        functools.partial(gcn_layer_kernel, relu=relu),
        out_shape=jax.ShapeDtypeStruct((n, cout), jnp.bfloat16),
        grid_spec=pltpu.PrefetchScalarGridSpec(
            num_scalar_prefetch=0,
            grid=grid,
            in_specs=[pl.BlockSpec((block_m, n), lambda i: (i, 0)),
                      pl.BlockSpec((n, cin), lambda i: (0, 0)),
                      pl.BlockSpec((cin, cout), lambda i: (0, 0)),
                      pl.BlockSpec((1, cout), lambda i: (0, 0))],
            out_specs=pl.BlockSpec((block_m, cout), lambda i: (i, 0)),
        ),
        compiler_params=pltpu.CompilerParams(
            dimension_semantics=("parallel",),
            vmem_limit_bytes=_vmem_limit(block_bytes)),
        cost_estimate=cost,
    )(adj, h, w, b)


def _pool_linear(h, mask_bias, wl, bl, *, block_m=BLOCK_M):
    n, hidden = h.shape
    g = mask_bias.shape[0]
    cout = wl.shape[1]
    grid = (pl.cdiv(n, block_m),)

    block_bytes = (block_m * hidden * 2 + g * block_m * 4 + hidden * cout * 2
                   + cout * 4 + g * cout * 4 + g * hidden * 4)
    cost = pl.CostEstimate(
        flops=2 * n * g * hidden + 2 * g * hidden * cout,
        transcendentals=0,
        bytes_accessed=n * hidden * 2 + g * n * 4 + hidden * cout * 2
                       + cout * 4 + g * cout * 4)

    return pl.pallas_call(
        pool_linear_kernel,
        out_shape=jax.ShapeDtypeStruct((g, cout), jnp.float32),
        grid_spec=pltpu.PrefetchScalarGridSpec(
            num_scalar_prefetch=0,
            grid=grid,
            in_specs=[pl.BlockSpec((block_m, hidden), lambda i: (i, 0)),
                      pl.BlockSpec((g, block_m), lambda i: (0, i)),
                      pl.BlockSpec((hidden, cout), lambda i: (0, 0)),
                      pl.BlockSpec((1, cout), lambda i: (0, 0))],
            out_specs=pl.BlockSpec((g, cout), lambda i: (0, 0)),
            scratch_shapes=[pltpu.VMEM((g, hidden), jnp.float32)],
        ),
        compiler_params=pltpu.CompilerParams(
            dimension_semantics=("arbitrary",),     # accumulator over row blocks
            vmem_limit_bytes=_vmem_limit(block_bytes)),
        cost_estimate=cost,
    )(h, mask_bias, wl, bl)


# ---------------------------------------------------------------------------
# Forward pass
# ---------------------------------------------------------------------------
def _build_norm_adj(edge_index, n):
    src, dst = edge_index[0], edge_index[1]
    # Count duplicate edges (like PyG) and add self loops.
    a = jnp.zeros((n, n), jnp.float32).at[dst, src].add(1.0)
    a = a + jnp.eye(n, dtype=jnp.float32)
    dinv = jax.lax.rsqrt(a.sum(axis=1))
    return a * dinv[:, None] * dinv[None, :]          # Â = D^-1/2 (A+I) D^-1/2


def gcn_forward(x, edge_index, batch, params, num_graphs, *, block_m=BLOCK_M):
    n, f_in = x.shape
    hidden = params["w1"].shape[1]
    num_classes = params["wl"].shape[1]

    n_pad = _round_up(n, block_m)
    f_pad = _round_up(f_in, LANE)
    h_pad = _round_up(hidden, LANE)
    c_pad = _round_up(num_classes, LANE)

    adj_p = _pad2(_build_norm_adj(edge_index, n), n_pad, n_pad).astype(jnp.bfloat16)
    x_p = _pad2(x, n_pad, f_pad).astype(jnp.bfloat16)

    w1 = _pad2(params["w1"], f_pad, h_pad).astype(jnp.bfloat16)
    w2 = _pad2(params["w2"], h_pad, h_pad).astype(jnp.bfloat16)
    w3 = _pad2(params["w3"], h_pad, h_pad).astype(jnp.bfloat16)
    wl = _pad2(params["wl"], h_pad, c_pad).astype(jnp.bfloat16)
    b1 = _pad2(params["b1"], 1, h_pad).astype(jnp.float32)
    b2 = _pad2(params["b2"], 1, h_pad).astype(jnp.float32)
    b3 = _pad2(params["b3"], 1, h_pad).astype(jnp.float32)
    bl = _pad2(params["bl"], 1, c_pad).astype(jnp.float32)

    # Additive pooling mask: 0 where node belongs to graph g, -1e30 elsewhere
    # (padded nodes belong to no graph).
    node_ids = jnp.arange(n_pad)
    batch_pad = jnp.where(node_ids < n, jnp.pad(batch, (0, n_pad - n)), -1)
    mask_bias = jnp.where(batch_pad[None, :] == jnp.arange(num_graphs)[:, None],
                          0.0, NEG_BIG).astype(jnp.float32)

    h1 = _gcn_conv(adj_p, x_p, w1, b1, relu=True, block_m=block_m)
    h2 = _gcn_conv(adj_p, h1, w2, b2, relu=True, block_m=block_m)
    h3 = _gcn_conv(adj_p, h2, w3, b3, relu=False, block_m=block_m)
    # F.dropout(p=0.5, training=False) is the identity; fused pool + Linear:
    out = _pool_linear(h3, mask_bias, wl, bl, block_m=block_m)
    return out[:, :num_classes]


def gcn_reference(x, edge_index, batch, params, num_graphs):
    """Pure-JAX f32 reference of the same forward pass (for validation)."""
    adj = _build_norm_adj(edge_index, x.shape[0])
    h = jnp.maximum(adj @ (x @ params["w1"]) + params["b1"], 0.0)
    h = jnp.maximum(adj @ (h @ params["w2"]) + params["b2"], 0.0)
    h = adj @ (h @ params["w3"]) + params["b3"]
    mask = batch[None, :] == jnp.arange(num_graphs)[:, None]
    pooled = jnp.max(jnp.where(mask[:, :, None], h[None, :, :], -jnp.inf), axis=1)
    return pooled @ params["wl"] + params["bl"]


def init_params(key, f_in, hidden, num_classes):
    ks = jax.random.split(key, 4)

    def glorot(k, shape):
        fan_in, fan_out = shape
        scale = jnp.sqrt(6.0 / (fan_in + fan_out))
        return jax.random.uniform(k, shape, jnp.float32, -scale, scale)

    return {
        "w1": glorot(ks[0], (f_in, hidden)),   "b1": jnp.zeros((1, hidden), jnp.float32),
        "w2": glorot(ks[1], (hidden, hidden)), "b2": jnp.zeros((1, hidden), jnp.float32),
        "w3": glorot(ks[2], (hidden, hidden)), "b3": jnp.zeros((1, hidden), jnp.float32),
        "wl": glorot(ks[3], (hidden, num_classes)),
        "bl": jnp.zeros((1, num_classes), jnp.float32),
    }


if __name__ == "__main__":
    # Small problem: 2 ring graphs x 80 nodes (so the 128-row grid has 2 steps),
    # 8 input features, 32 hidden channels, 4 classes.
    N_PER_GRAPH = 80
    NUM_GRAPHS = 2
    N = N_PER_GRAPH * NUM_GRAPHS
    F_IN = 8
    HIDDEN = 32
    NUM_CLASSES = 4

    key = jax.random.PRNGKey(0)
    k_x, k_p = jax.random.split(key)
    x = jax.random.normal(k_x, (N, F_IN), jnp.float32)

    srcs, dsts = [], []
    for g in range(NUM_GRAPHS):
        base = g * N_PER_GRAPH
        for i in range(N_PER_GRAPH):
            a = base + i
            b = base + (i + 1) % N_PER_GRAPH
            srcs += [a, b]
            dsts += [b, a]
    edge_index = jnp.array([srcs, dsts], dtype=jnp.int32)                          # [2, E]
    batch = jnp.repeat(jnp.arange(NUM_GRAPHS, dtype=jnp.int32), N_PER_GRAPH)       # [N]

    params = init_params(k_p, F_IN, HIDDEN, NUM_CLASSES)

    fwd = jax.jit(functools.partial(gcn_forward, num_graphs=NUM_GRAPHS))
    out = jax.block_until_ready(fwd(x, edge_index, batch, params))
    assert out.shape == (NUM_GRAPHS, NUM_CLASSES)

    ref = gcn_reference(x, edge_index, batch, params, NUM_GRAPHS)
    err = float(jnp.max(jnp.abs(out - ref)))
    assert err < 0.2, f"max abs error vs f32 reference: {err}"
    print("KERNEL_OK")
</pallas_src>

<mosaic_0001>
module attributes {stable_mosaic.version = 11 : i64} {
  func.func private @main(%arg0: i32) attributes {dimension_semantics = [#tpu.dimension_semantics<core_parallel>], iteration_bounds = array<i64: 2>, tpu.core_type = #tpu.core_type<sc_scalar_subcore>, window_params = []} {
    return
  }
}

module attributes {stable_mosaic.version = 11 : i64} {
  func.func private @main(%arg0: i32) attributes {dimension_semantics = [#tpu.dimension_semantics<core_parallel>], iteration_bounds = array<i64: 2>, tpu.core_type = #tpu.core_type<sc_scalar_subcore>, window_params = []} {
    return
  }
}

module attributes {stable_mosaic.version = 11 : i64} {
  func.func @gcn_layer_kernel(%arg0: i32, %arg1: memref<128x256xbf16, #tpu.memory_space<vmem>>, %arg2: memref<256x128xbf16, #tpu.memory_space<vmem>>, %arg3: memref<128x128xbf16, #tpu.memory_space<vmem>>, %arg4: memref<1x128xf32, #tpu.memory_space<vmem>>, %arg5: memref<128x128xbf16, #tpu.memory_space<vmem>>) attributes {dimension_semantics = [#tpu.dimension_semantics<parallel>], iteration_bounds = array<i64: 2>, scalar_prefetch = 0 : i64, scratch_operands = 0 : i64, tpu.core_type = #tpu.core_type<tc>, window_params = [{transform_indices = @transform_0, window_bounds = array<i64: 128, 256>}, {pipeline_mode = #tpu.pipeline_mode<synchronous>, transform_indices = @transform_1, window_bounds = array<i64: 256, 128>}, {pipeline_mode = #tpu.pipeline_mode<synchronous>, transform_indices = @transform_2, window_bounds = array<i64: 128, 128>}, {pipeline_mode = #tpu.pipeline_mode<synchronous>, transform_indices = @transform_3, window_bounds = array<i64: 1, 128>}, {transform_indices = @transform_4, window_bounds = array<i64: 128, 128>}]} {
    %c0 = arith.constant 0 : index
    %c0_0 = arith.constant 0 : index
    %0 = vector.load %arg1[%c0, %c0_0] : memref<128x256xbf16, #tpu.memory_space<vmem>>, vector<128x256xbf16>
    %c0_1 = arith.constant 0 : index
    %c0_2 = arith.constant 0 : index
    %1 = vector.load %arg2[%c0_1, %c0_2] : memref<256x128xbf16, #tpu.memory_space<vmem>>, vector<256x128xbf16>
    %cst = arith.constant dense<0.000000e+00> : vector<128x128xf32>
    %2 = tpu.matmul %0, %1, %cst {dimension_numbers = #tpu.dot_dimension_numbers<[1], [0], [0], [1], [0, 0, 1, 1], [], []>} : vector<128x256xbf16>, vector<256x128xbf16>, vector<128x128xf32> -> vector<128x128xf32>
    %3 = arith.truncf %2 : vector<128x128xf32> to vector<128x128xbf16>
    %c0_3 = arith.constant 0 : index
    %c0_4 = arith.constant 0 : index
    %4 = vector.load %arg3[%c0_3, %c0_4] : memref<128x128xbf16, #tpu.memory_space<vmem>>, vector<128x128xbf16>
    %cst_5 = arith.constant dense<0.000000e+00> : vector<128x128xf32>
    %5 = tpu.matmul %3, %4, %cst_5 {dimension_numbers = #tpu.dot_dimension_numbers<[1], [0], [0], [1], [0, 0, 1, 1], [], []>} : vector<128x128xbf16>, vector<128x128xbf16>, vector<128x128xf32> -> vector<128x128xf32>
    %c0_6 = arith.constant 0 : index
    %c0_7 = arith.constant 0 : index
    %6 = vector.load %arg4[%c0_6, %c0_7] : memref<1x128xf32, #tpu.memory_space<vmem>>, vector<1x128xf32>
    %7 = vector.broadcast %6 : vector<1x128xf32> to vector<128x128xf32>
    %8 = arith.addf %5, %7 : vector<128x128xf32>
    %cst_8 = arith.constant 0.000000e+00 : f32
    %9 = vector.broadcast %cst_8 : f32 to vector<128x128xf32>
    %10 = arith.maximumf %8, %9 : vector<128x128xf32>
    %11 = arith.truncf %10 : vector<128x128xf32> to vector<128x128xbf16>
    %c0_9 = arith.constant 0 : index
    %c0_10 = arith.constant 0 : index
    %12 = vector.load %arg5[%c0_9, %c0_10] : memref<128x128xbf16, #tpu.memory_space<vmem>>, vector<128x128xbf16>
    tpu.vector_store %arg5[%c0_9, %c0_10], %11 {strides = array<i32>} : memref<128x128xbf16, #tpu.memory_space<vmem>>, vector<128x128xbf16>,
    return
  }
  func.func @transform_0(%arg0: i32) -> (i32, i32) {
    %c0_i32 = arith.constant 0 : i32
    %c0_i32_0 = arith.constant 0 : i32
    return %arg0, %c0_i32 : i32, i32
  }
  func.func @transform_1(%arg0: i32) -> (i32, i32) {
    %c0_i32 = arith.constant 0 : i32
    %c0_i32_0 = arith.constant 0 : i32
    %c0_i32_1 = arith.constant 0 : i32
    return %c0_i32, %c0_i32_0 : i32, i32
  }
  func.func @transform_2(%arg0: i32) -> (i32, i32) {
    %c0_i32 = arith.constant 0 : i32
    %c0_i32_0 = arith.constant 0 : i32
    %c0_i32_1 = arith.constant 0 : i32
    return %c0_i32, %c0_i32_0 : i32, i32
  }
  func.func @transform_3(%arg0: i32) -> (i32, i32) {
    %c0_i32 = arith.constant 0 : i32
    %c0_i32_0 = arith.constant 0 : i32
    %c0_i32_1 = arith.constant 0 : i32
    return %c0_i32, %c0_i32_0 : i32, i32
  }
  func.func @transform_4(%arg0: i32) -> (i32, i32) {
    %c0_i32 = arith.constant 0 : i32
    %c0_i32_0 = arith.constant 0 : i32
    return %arg0, %c0_i32 : i32, i32
  }
}

module attributes {stable_mosaic.version = 11 : i64} {
  func.func @gcn_layer_kernel(%arg0: i32, %arg1: memref<128x256xbf16, #tpu.memory_space<vmem>>, %arg2: memref<256x128xbf16, #tpu.memory_space<vmem>>, %arg3: memref<128x128xbf16, #tpu.memory_space<vmem>>, %arg4: memref<1x128xf32, #tpu.memory_space<vmem>>, %arg5: memref<128x128xbf16, #tpu.memory_space<vmem>>) attributes {dimension_semantics = [#tpu.dimension_semantics<parallel>], iteration_bounds = array<i64: 2>, scalar_prefetch = 0 : i64, scratch_operands = 0 : i64, tpu.core_type = #tpu.core_type<tc>, window_params = [{transform_indices = @transform_0, window_bounds = array<i64: 128, 256>}, {pipeline_mode = #tpu.pipeline_mode<synchronous>, transform_indices = @transform_1, window_bounds = array<i64: 256, 128>}, {pipeline_mode = #tpu.pipeline_mode<synchronous>, transform_indices = @transform_2, window_bounds = array<i64: 128, 128>}, {pipeline_mode = #tpu.pipeline_mode<synchronous>, transform_indices = @transform_3, window_bounds = array<i64: 1, 128>}, {transform_indices = @transform_4, window_bounds = array<i64: 128, 128>}]} {
    %c0 = arith.constant 0 : index
    %c0_0 = arith.constant 0 : index
    %0 = vector.load %arg1[%c0, %c0_0] : memref<128x256xbf16, #tpu.memory_space<vmem>>, vector<128x256xbf16>
    %c0_1 = arith.constant 0 : index
    %c0_2 = arith.constant 0 : index
    %1 = vector.load %arg2[%c0_1, %c0_2] : memref<256x128xbf16, #tpu.memory_space<vmem>>, vector<256x128xbf16>
    %cst = arith.constant dense<0.000000e+00> : vector<128x128xf32>
    %2 = tpu.matmul %0, %1, %cst {dimension_numbers = #tpu.dot_dimension_numbers<[1], [0], [0], [1], [0, 0, 1, 1], [], []>} : vector<128x256xbf16>, vector<256x128xbf16>, vector<128x128xf32> -> vector<128x128xf32>
    %3 = arith.truncf %2 : vector<128x128xf32> to vector<128x128xbf16>
    %c0_3 = arith.constant 0 : index
    %c0_4 = arith.constant 0 : index
    %4 = vector.load %arg3[%c0_3, %c0_4] : memref<128x128xbf16, #tpu.memory_space<vmem>>, vector<128x128xbf16>
    %cst_5 = arith.constant dense<0.000000e+00> : vector<128x128xf32>
    %5 = tpu.matmul %3, %4, %cst_5 {dimension_numbers = #tpu.dot_dimension_numbers<[1], [0], [0], [1], [0, 0, 1, 1], [], []>} : vector<128x128xbf16>, vector<128x128xbf16>, vector<128x128xf32> -> vector<128x128xf32>
    %c0_6 = arith.constant 0 : index
    %c0_7 = arith.constant 0 : index
    %6 = vector.load %arg4[%c0_6, %c0_7] : memref<1x128xf32, #tpu.memory_space<vmem>>, vector<1x128xf32>
    %7 = vector.broadcast %6 : vector<1x128xf32> to vector<128x128xf32>
    %8 = arith.addf %5, %7 : vector<128x128xf32>
    %9 = arith.truncf %8 : vector<128x128xf32> to vector<128x128xbf16>
    %c0_8 = arith.constant 0 : index
    %c0_9 = arith.constant 0 : index
    %10 = vector.load %arg5[%c0_8, %c0_9] : memref<128x128xbf16, #tpu.memory_space<vmem>>, vector<128x128xbf16>
    tpu.vector_store %arg5[%c0_8, %c0_9], %9 {strides = array<i32>} : memref<128x128xbf16, #tpu.memory_space<vmem>>, vector<128x128xbf16>,
    return
  }
  func.func @transform_0(%arg0: i32) -> (i32, i32) {
    %c0_i32 = arith.constant 0 : i32
    %c0_i32_0 = arith.constant 0 : i32
    return %arg0, %c0_i32 : i32, i32
  }
  func.func @transform_1(%arg0: i32) -> (i32, i32) {
    %c0_i32 = arith.constant 0 : i32
    %c0_i32_0 = arith.constant 0 : i32
    %c0_i32_1 = arith.constant 0 : i32
    return %c0_i32, %c0_i32_0 : i32, i32
  }
  func.func @transform_2(%arg0: i32) -> (i32, i32) {
    %c0_i32 = arith.constant 0 : i32
    %c0_i32_0 = arith.constant 0 : i32
    %c0_i32_1 = arith.constant 0 : i32
    return %c0_i32, %c0_i32_0 : i32, i32
  }
  func.func @transform_3(%arg0: i32) -> (i32, i32) {
    %c0_i32 = arith.constant 0 : i32
    %c0_i32_0 = arith.constant 0 : i32
    %c0_i32_1 = arith.constant 0 : i32
    return %c0_i32, %c0_i32_0 : i32, i32
  }
  func.func @transform_4(%arg0: i32) -> (i32, i32) {
    %c0_i32 = arith.constant 0 : i32
    %c0_i32_0 = arith.constant 0 : i32
    return %arg0, %c0_i32 : i32, i32
  }
}

module attributes {stable_mosaic.version = 11 : i64} {
  func.func @pool_linear_kernel(%arg0: i32, %arg1: memref<128x128xbf16, #tpu.memory_space<vmem>>, %arg2: memref<2x128xf32, #tpu.memory_space<vmem>>, %arg3: memref<128x128xbf16, #tpu.memory_space<vmem>>, %arg4: memref<1x128xf32, #tpu.memory_space<vmem>>, %arg5: memref<2x128xf32, #tpu.memory_space<vmem>>, %arg6: memref<2x128xf32, #tpu.memory_space<vmem>>) attributes {dimension_semantics = [#tpu.dimension_semantics<arbitrary>], iteration_bounds = array<i64: 2>, scalar_prefetch = 0 : i64, scratch_operands = 1 : i64, tpu.core_type = #tpu.core_type<tc>, window_params = [{transform_indices = @transform_0, window_bounds = array<i64: 128, 128>}, {transform_indices = @transform_1, window_bounds = array<i64: 2, 128>}, {pipeline_mode = #tpu.pipeline_mode<synchronous>, transform_indices = @transform_2, window_bounds = array<i64: 128, 128>}, {pipeline_mode = #tpu.pipeline_mode<synchronous>, transform_indices = @transform_3, window_bounds = array<i64: 1, 128>}, {pipeline_mode = #tpu.pipeline_mode<synchronous>, transform_indices = @transform_4, window_bounds = array<i64: 2, 128>}]} {
    %c0_i32 = arith.constant 0 : i32
    %0 = arith.cmpi eq, %arg0, %c0_i32 : i32
    %1 = arith.extui %0 : i1 to i32
    %c0_i32_0 = arith.constant 0 : i32
    %2 = arith.cmpi ne, %1, %c0_i32_0 : i32
    scf.if %2 {
      %cst_9 = arith.constant -1.000000e+30 : f32
      %18 = vector.broadcast %cst_9 : f32 to vector<2x128xf32>
      %c0_10 = arith.constant 0 : index
      %c0_11 = arith.constant 0 : index
      %19 = vector.load %arg6[%c0_10, %c0_11] : memref<2x128xf32, #tpu.memory_space<vmem>>, vector<2x128xf32>
      tpu.vector_store %arg6[%c0_10, %c0_11], %18 {strides = array<i32>} : memref<2x128xf32, #tpu.memory_space<vmem>>, vector<2x128xf32>,
    } else {
    }
    %c0 = arith.constant 0 : index
    %c0_1 = arith.constant 0 : index
    %3 = vector.load %arg1[%c0, %c0_1] : memref<128x128xbf16, #tpu.memory_space<vmem>>, vector<128x128xbf16>
    %4 = arith.extf %3 : vector<128x128xbf16> to vector<128x128xf32>
    %c0_2 = arith.constant 0 : index
    %c0_3 = arith.constant 0 : index
    %5 = vector.load %arg2[%c0_2, %c0_3] : memref<2x128xf32, #tpu.memory_space<vmem>>, vector<2x128xf32>
    %6 = vector.shape_cast %5 : vector<2x128xf32> to vector<2x128x1xf32>
    %7 = vector.shape_cast %4 : vector<128x128xf32> to vector<1x128x128xf32>
    %8 = vector.broadcast %6 : vector<2x128x1xf32> to vector<2x128x128xf32>
    %9 = vector.broadcast %7 : vector<1x128x128xf32> to vector<2x128x128xf32>
    %10 = arith.addf %8, %9 : vector<2x128x128xf32>
    %cst = arith.constant dense<0xFF800000> : vector<2x128xf32>
    %11 = vector.multi_reduction <maximumf>, %10, %cst [1] : vector<2x128x128xf32> to vector<2x128xf32>
    %c0_4 = arith.constant 0 : index
    %c0_5 = arith.constant 0 : index
    %12 = vector.load %arg6[%c0_4, %c0_5] : memref<2x128xf32, #tpu.memory_space<vmem>>, vector<2x128xf32>
    %13 = arith.maximumf %12, %11 : vector<2x128xf32>
    %c0_6 = arith.constant 0 : index
    %c0_7 = arith.constant 0 : index
    %14 = vector.load %arg6[%c0_6, %c0_7] : memref<2x128xf32, #tpu.memory_space<vmem>>, vector<2x128xf32>
    tpu.vector_store %arg6[%c0_6, %c0_7], %13 {strides = array<i32>} : memref<2x128xf32, #tpu.memory_space<vmem>>, vector<2x128xf32>,
    %c1_i32 = arith.constant 1 : i32
    %15 = arith.cmpi eq, %arg0, %c1_i32 : i32
    %16 = arith.extui %15 : i1 to i32
    %c0_i32_8 = arith.constant 0 : i32
    %17 = arith.cmpi ne, %16, %c0_i32_8 : i32
    scf.if %17 {
      %c0_9 = arith.constant 0 : index
      %c0_10 = arith.constant 0 : index
      %18 = vector.load %arg6[%c0_9, %c0_10] : memref<2x128xf32, #tpu.memory_space<vmem>>, vector<2x128xf32>
      %19 = arith.truncf %18 : vector<2x128xf32> to vector<2x128xbf16>
      %c0_11 = arith.constant 0 : index
      %c0_12 = arith.constant 0 : index
      %20 = vector.load %arg3[%c0_11, %c0_12] : memref<128x128xbf16, #tpu.memory_space<vmem>>, vector<128x128xbf16>
      %cst_13 = arith.constant dense<0.000000e+00> : vector<2x128xf32>
      %21 = tpu.matmul %19, %20, %cst_13 {dimension_numbers = #tpu.dot_dimension_numbers<[1], [0], [0], [1], [0, 0, 1, 1], [], []>} : vector<2x128xbf16>, vector<128x128xbf16>, vector<2x128xf32> -> vector<2x128xf32>
      %c0_14 = arith.constant 0 : index
      %c0_15 = arith.constant 0 : index
      %22 = vector.load %arg4[%c0_14, %c0_15] : memref<1x128xf32, #tpu.memory_space<vmem>>, vector<1x128xf32>
      %23 = vector.broadcast %22 : vector<1x128xf32> to vector<2x128xf32>
      %24 = arith.addf %21, %23 : vector<2x128xf32>
      %c0_16 = arith.constant 0 : index
      %c0_17 = arith.constant 0 : index
      %25 = vector.load %arg5[%c0_16, %c0_17] : memref<2x128xf32, #tpu.memory_space<vmem>>, vector<2x128xf32>
      tpu.vector_store %arg5[%c0_16, %c0_17], %24 {strides = array<i32>} : memref<2x128xf32, #tpu.memory_space<vmem>>, vector<2x128xf32>,
    } else {
    }
    return
  }
  func.func @transform_0(%arg0: i32) -> (i32, i32) {
    %c0_i32 = arith.constant 0 : i32
    %c0_i32_0 = arith.constant 0 : i32
    return %arg0, %c0_i32 : i32, i32
  }
  func.func @transform_1(%arg0: i32) -> (i32, i32) {
    %c0_i32 = arith.constant 0 : i32
    %c0_i32_0 = arith.constant 0 : i32
    return %c0_i32, %arg0 : i32, i32
  }
  func.func @transform_2(%arg0: i32) -> (i32, i32) {
    %c0_i32 = arith.constant 0 : i32
    %c0_i32_0 = arith.constant 0 : i32
    %c0_i32_1 = arith.constant 0 : i32
    return %c0_i32, %c0_i32_0 : i32, i32
  }
  func.func @transform_3(%arg0: i32) -> (i32, i32) {
    %c0_i32 = arith.constant 0 : i32
    %c0_i32_0 = arith.constant 0 : i32
    %c0_i32_1 = arith.constant 0 : i32
    return %c0_i32, %c0_i32_0 : i32, i32
  }
  func.func @transform_4(%arg0: i32) -> (i32, i32) {
    %c0_i32 = arith.constant 0 : i32
    %c0_i32_0 = arith.constant 0 : i32
    %c0_i32_1 = arith.constant 0 : i32
    return %c0_i32, %c0_i32_0 : i32, i32
  }
}

</mosaic_0001>

<bundles_post_ra>
// kernel: gcn_forward.7
= control target key start
LH: loop header
LB: loop body
LE: loop exit
PB: predicated region body
PF: predicated region fallthrough
CT: control target
= control target key end

     0   :  { %9 = vsyncpa [#allocation4], 0  ;;  %s817_s15 = smov 0   ;;  %s901_s0 = inlined_call_operand.vmem [shape: bf16[256,128], index: 0, kind: input, shape index: {}]   ;;  %s902_s1 = inlined_call_operand.vmem [shape: f32[2,256], index: 1, kind: input, shape index: {}]   ;;  %s903_s2 = inlined_call_operand.vmem [shape: bf16[128,128], index: 2, kind: input, shape index: {}]   ;;  %s904_s3 = inlined_call_operand.vmem [shape: f32[1,128], index: 3, kind: input, shape index: {}]   ;;  %s905_s4 = inlined_call_operand.hbm [shape: f32[2,128], index: 4, kind: output, shape index: {}]  }
   0x1 LB: > { %s823_s16 = sadd.s32 4294967295, %s786_s15   ;;  %p637_p0 = scmp.ge.s32.totalorder %s786_s15, 1  ;;  %s786_s15 = sphi %s817_s15, %s15_s15  }
   0x2   : > { %p168_p1 = scmp.lt.s32.totalorder %s786_s15, 3 }
   0x4   : > { %p169_p2 = pnand %p637_p0, %p168_p1 }
   0x5   : > { %s638_s17 = sshll.u32 (!%p169_p2), %s823_s16, 4  ;;  %p199_p3 = scmp.lt.s32.totalorder (!%p169_p2), %s823_s16, 1 }
   0x6   : > { %172 = sbr.rel (%p169_p2) target bundleno = 475 (0x1db), region = 36  ;;  %p194_p4 = scmp.lt.s32.totalorder (!%p169_p2), %s638_s17, 31 }
   0x7   : > { %p641_p5 = scmp.ne.s32.totalorder (!%p169_p2), %s823_s16, 0 }
   0xd   : > { %s200_s18 = scalar_select %p199_p3, %s823_s16, 1 }
   0xe   : > { %s907_s17 = smov (!%p194_p4, %s638_s17), 31  ;;  %207 = sbr.rel (%p641_p5) target bundleno = 21 (0x15), region = 40 }
   0xf   : > { %s640_s19 = sshll.u32 %s200_s18, 1  ;;  %s639_s20 = sshll.u32 %s907_s17, 2  ;;  %v788_v0 = vmov (!%p641_p5), -1e+30  }
  0x10   : > { %s202_s23 = scalar_lea.vmem %s902_s1, %s640_s19  ;;  %s836_s26 = scalar_lea.vmem %s901_s0, %s639_s20  ;;  %208 = vst [vmem:[#allocation2] sm:$0x3] (!%p641_p5), %v788_v0 }
  0x15 PF: > { %v242_v1 = vlaneseq  ;;  %v241_v3 = vld [vmem:[%s202_s23] sm:$0x3]  ;;  %v688_v26 = vld [vmem:[%s836_s26 + $0x8] sm:$0xff]   ;;  %v689_v30 = vld [vmem:[%s836_s26 + $0x10] sm:$0xff]   ;;  %vm453_vm0 = vcmask 1041409   ;;  %p642_p6 = scmp.ne.s32.totalorder %s823_s16, 1 }
  0x16   : > { %v657_v27 = vld [vmem:[%s836_s26] sm:$0xff]   ;;  %v662_v31 = vunpack.c.l.bf16 %v688_v26  ;;  %v663_v33 = vunpack.c.h.bf16 %v688_v26  ;;  %v690_v35 = vld [vmem:[%s836_s26 + $0x18] sm:$0xff]   ;;  %v667_v36 = vunpack.c.h.bf16 %v689_v30  ;;  %v666_v39 = vunpack.c.l.bf16 %v689_v30  ;;  %v692_v42 = vld [vmem:[%s836_s26 + $0x28] sm:$0xff]  }
  0x17   : > { %v243_v2 = vshrl.u32 %v242_v1, 7  ;;  %v658_v32 = vunpack.c.l.bf16 %v657_v27  ;;  %v659_v34 = vunpack.c.h.bf16 %v657_v27  ;;  %v671_v40 = vunpack.c.h.bf16 %v690_v35  ;;  %v691_v41 = vld [vmem:[%s836_s26 + $0x20] sm:$0xff]   ;;  %v693_v58 = vld [vmem:[%s836_s26 + $0x30] sm:$0xff]  }
  0x18   : > { %v670_v47 = vunpack.c.l.bf16 %v690_v35  ;;  %v675_v49 = vunpack.c.h.bf16 %v691_v41  ;;  %v674_v50 = vunpack.c.l.bf16 %v691_v41  ;;  %v679_v51 = vunpack.c.h.bf16 %v692_v42 }
  0x19   : > { %v244_v4 = vsub.s32 0, %v243_v2  ;;  %v311_v6 = vsub.s32 1, %v243_v2  ;;  %v678_v57 = vunpack.c.l.bf16 %v692_v42  ;;  %vm790_vm1 = vmmov (!%p642_p6), 0  }
  0x1b   : > { %v245_v5 = vrot.slane %v241_v3, %v244_v4  ;;  %v312_v7 = vrot.slane %v241_v3, %v311_v6  ;;  %v683_v6 = vunpack.c.h.bf16 %v693_v58 }
  0x1d   : > { %255 = vbcast.lane.b32.xlu1 %v245_v5, 272  ;;  %247 = vbcast.lane.b32.xlu0 %v245_v5, 256 }
  0x21   : > { %259 = vbcast.lane.b32.xlu1 %v245_v5, 280  ;;  %251 = vbcast.lane.b32.xlu0 %v245_v5, 264 }
  0x25   : > { %318 = vbcast.lane.b32.xlu1 %v312_v7, 264  ;;  %314 = vbcast.lane.b32.xlu0 %v312_v7, 256 }
  0x29   : > { %326 = vbcast.lane.b32.xlu1 %v312_v7, 280  ;;  %322 = vbcast.lane.b32.xlu0 %v312_v7, 272 }
  0x2d   : > { %267 = vbcast.lane.b32.xlu1 %v245_v5, 296  ;;  %263 = vbcast.lane.b32.xlu0 %v245_v5, 288 }
  0x31   : > { %334 = vbcast.lane.b32.xlu1 %v312_v7, 296  ;;  %330 = vbcast.lane.b32.xlu0 %v312_v7, 288 }
  0x35   : > { %275 = vbcast.lane.b32.xlu1 %v245_v5, 312  ;;  %271 = vbcast.lane.b32.xlu0 %v245_v5, 304 }
  0x39   : > { %342 = vbcast.lane.b32.xlu1 %v312_v7, 312  ;;  %338 = vbcast.lane.b32.xlu0 %v312_v7, 304 }
  0x3d   : > { %283 = vbcast.lane.b32.xlu1 %v245_v5, 328  ;;  %279 = vbcast.lane.b32.xlu0 %v245_v5, 320 }
  0x41   : > { %350 = vbcast.lane.b32.xlu1 %v312_v7, 328  ;;  %346 = vbcast.lane.b32.xlu0 %v312_v7, 320 }
  0x45   : > { %291 = vbcast.lane.b32.xlu1 %v245_v5, 344  ;;  %287 = vbcast.lane.b32.xlu0 %v245_v5, 336 }
  0x49   : > { %358 = vbcast.lane.b32.xlu1 %v312_v7, 344  ;;  %354 = vbcast.lane.b32.xlu0 %v312_v7, 336 }
  0x4d   : > { %299 = vbcast.lane.b32.xlu1 %v245_v5, 360  ;;  %295 = vbcast.lane.b32.xlu0 %v245_v5, 352 }
  0x51   : > { %366 = vbcast.lane.b32.xlu1 %v312_v7, 360  ;;  %362 = vbcast.lane.b32.xlu0 %v312_v7, 352 }
  0x55   : > { %307 = vbcast.lane.b32.xlu1 %v245_v5, 376  ;;  %303 = vbcast.lane.b32.xlu0 %v245_v5, 368 }
  0x59   : > { %374 = vbcast.lane.b32.xlu1 %v312_v7, 376  ;;  %370 = vbcast.lane.b32.xlu0 %v312_v7, 368 }
  0x8f   : > { %v256_v8 = vpop.permute.xlu1 %255  ;;  %v248_v9 = vpop.permute.xlu0 %247 }
  0x90   : > { %v378_v43 = vadd.f32 %v662_v31, %v256_v8  ;;  %v376_v44 = vadd.f32 %v658_v32, %v248_v9  ;;  %v682_v8 = vunpack.c.l.bf16 %v693_v58 }
  0x92   : > { %v408_v59 = vmax.f32 %v376_v44, %v378_v43 }
  0x93   : > { %v260_v10 = vpop.permute.xlu1 %259  ;;  %v252_v11 = vpop.permute.xlu0 %251 }
  0x94   : > { %v379_v45 = vadd.f32 %v663_v33, %v260_v10  ;;  %v377_v46 = vadd.f32 %v659_v34, %v252_v11 }
  0x96   : > { %v409_v60 = vmax.f32 %v377_v46, %v379_v45 }
  0x97   : > { %v319_v12 = vpop.permute.xlu1 %318  ;;  %v315_v13 = vpop.permute.xlu0 %314 }
  0x98   : > { %v393_v61 = vadd.f32 %v659_v34, %v319_v12  ;;  %v392_v63 = vadd.f32 %v658_v32, %v315_v13 }
  0x9b   : > { %v327_v14 = vpop.permute.xlu1 %326  ;;  %v323_v15 = vpop.permute.xlu0 %322 }
  0x9c   : > { %v395_v54 = vadd.f32 %v663_v33, %v327_v14  ;;  %v394_v55 = vadd.f32 %v662_v31, %v323_v15 }
  0x9e   : > { %v430_v9 = vmax.f32 %v393_v61, %v395_v54  ;;  %v429_v10 = vmax.f32 %v392_v63, %v394_v55 }
  0x9f   : > { %v268_v16 = vpop.permute.xlu1 %267  ;;  %v264_v17 = vpop.permute.xlu0 %263 }
  0xa0   : > { %v381_v48 = vadd.f32 %v667_v36, %v268_v16  ;;  %v380_v56 = vadd.f32 %v666_v39, %v264_v17 }
  0xa2   : > { %v411_v3 = vmax.f32 %v409_v60, %v381_v48  ;;  %v410_v11 = vmax.f32 %v408_v59, %v380_v56 }
  0xa3   : > { %v335_v18 = vpop.permute.xlu1 %334  ;;  %v331_v19 = vpop.permute.xlu0 %330 }
  0xa4   : > { %v397_v0 = vadd.f32 %v667_v36, %v335_v18  ;;  %v396_v1 = vadd.f32 %v666_v39, %v331_v19 }
  0xa6   : > { %v432_v13 = vmax.f32 %v430_v9, %v397_v0  ;;  %v431_v18 = vmax.f32 %v429_v10, %v396_v1  ;;  %v450_v9 = vld [vmem:[#allocation2] sm:$0x3] }
  0xa7   : > { %v276_v20 = vpop.permute.xlu1 %275  ;;  %v272_v21 = vpop.permute.xlu0 %271 }
  0xa8   : > { %v383_v62 = vadd.f32 %v671_v40, %v276_v20  ;;  %v382_v2 = vadd.f32 %v670_v47, %v272_v21  ;;  %v694_v20 = vld [vmem:[%s836_s26 + $0x38] sm:$0xff]  }
  0xa9   : > { %v687_v35 = vunpack.c.h.bf16 %v694_v20  ;;  %v686_v36 = vunpack.c.l.bf16 %v694_v20  ;;  %v745_v20 = vld [vmem:[%s903_s2 + $0x18] sm:$0xff] (!%p642_p6)  }
  0xaa   : > { %v413_v15 = vmax.f32 %v411_v3, %v383_v62  ;;  %v412_v19 = vmax.f32 %v410_v11, %v382_v2 }
  0xab   : > { %v343_v22 = vpop.permute.xlu1 %342  ;;  %v339_v23 = vpop.permute.xlu0 %338 }
  0xac   : > { %v399_v16 = vadd.f32 %v671_v40, %v343_v22  ;;  %v398_v17 = vadd.f32 %v670_v47, %v339_v23 }
  0xae   : > { %v433_v39 = vmax.f32 %v431_v18, %v398_v17  ;;  %v743_v17 = vld [vmem:[%s903_s2 + $0x8] sm:$0xff] (!%p642_p6)  }
  0xaf   : > { %v284_v24 = vpop.permute.xlu1 %283  ;;  %v280_v25 = vpop.permute.xlu0 %279  ;;  %v747_v18 = vld [vmem:[%s903_s2 + $0x28] sm:$0xff] (!%p642_p6)  }
  0xb0   : > { %v385_v4 = vadd.f32 %v675_v49, %v284_v24  ;;  %v384_v14 = vadd.f32 %v674_v50, %v280_v25  ;;  %v434_v25 = vmax.f32 %v432_v13, %v399_v16  ;;  %v789_v16 = vmov (!%p642_p6), 0.0   ;;  %v746_v13 = vld [vmem:[%s903_s2 + $0x20] sm:$0xff] (!%p642_p6)  }
  0xb1   : > { %704 = vmatprep.subr.bf16.mxu0 (!%p642_p6), %v789_v16  ;;  %720 = vmatprep.mubr.msk.bf16.mxu0 (!%p642_p6), %vm790_vm1, %v789_v16 }
  0xb2   : > { %v415_v21 = vmax.f32 %v413_v15, %v385_v4  ;;  %v414_v33 = vmax.f32 %v412_v19, %v384_v14  ;;  %v742_v15 = vld [vmem:[%s903_s2] sm:$0xff] (!%p642_p6)   ;;  %v748_v19 = vld [vmem:[%s903_s2 + $0x30] sm:$0xff] (!%p642_p6)  }
  0xb3   : > { %v351_v28 = vpop.permute.xlu1 %350  ;;  %v347_v29 = vpop.permute.xlu0 %346  ;;  %705 = vmatpush3.bf16.msra.mxu0 (!%p642_p6), %v742_v15 }
  0xb4   : > { %v401_v27 = vadd.f32 %v675_v49, %v351_v28  ;;  %v400_v24 = vadd.f32 %v674_v50, %v347_v29  ;;  %706 = vmatprep.subr.bf16.mxu0 (!%p642_p6), %v789_v16 }
  0xb6   : > { %v436_v41 = vmax.f32 %v434_v25, %v401_v27  ;;  %v435_v42 = vmax.f32 %v433_v39, %v400_v24  ;;  %v643_v24 = vld [vmem:[%s904_s3] ss:$0 sm:$0xff] (!%p642_p6) }
  0xb7   : > { %v292_v37 = vpop.permute.xlu1 %291  ;;  %v288_v38 = vpop.permute.xlu0 %287  ;;  %707 = vmatpush3.bf16.msra.mxu0 (!%p642_p6), %v743_v17 }
  0xb8   : > { %v387_v12 = vadd.f32 %v679_v51, %v292_v37  ;;  %v386_v26 = vadd.f32 %v678_v57, %v288_v38  ;;  %708 = vmatprep.subr.bf16.mxu0 (!%p642_p6), %v789_v16 }
  0xba   : > { %v417_v22 = vmax.f32 %v415_v21, %v387_v12  ;;  %v416_v37 = vmax.f32 %v414_v33, %v386_v26  ;;  %v744_v12 = vld [vmem:[%s903_s2 + $0x10] sm:$0xff] (!%p642_p6)   ;;  %v749_v26 = vld [vmem:[%s903_s2 + $0x38] sm:$0xff] (!%p642_p6)  }
  0xbb   : > { %v359_v52 = vpop.permute.xlu1 %358  ;;  %v355_v53 = vpop.permute.xlu0 %354  ;;  %709 = vmatpush3.bf16.msra.mxu0 (!%p642_p6), %v744_v12 }
  0xbc   : > { %v403_v23 = vadd.f32 %v679_v51, %v359_v52  ;;  %v402_v40 = vadd.f32 %v678_v57, %v355_v53  ;;  %710 = vmatprep.subr.bf16.mxu0 (!%p642_p6), %v789_v16 }
  0xbe   : > { %v438_v48 = vmax.f32 %v436_v41, %v403_v23  ;;  %v437_v49 = vmax.f32 %v435_v42, %v402_v40 }
  0xbf   : > { %v300_v5 = vpop.permute.xlu1 %299  ;;  %v296_v7 = vpop.permute.xlu0 %295  ;;  %711 = vmatpush3.bf16.msra.mxu0 (!%p642_p6), %v745_v20 }
  0xc0   : > { %v389_v30 = vadd.f32 %v683_v6, %v300_v5  ;;  %v388_v34 = vadd.f32 %v682_v8, %v296_v7  ;;  %712 = vmatprep.subr.bf16.mxu0 (!%p642_p6), %v789_v16 }
  0xc2   : > { %v419_v43 = vmax.f32 %v417_v22, %v389_v30  ;;  %v418_v29 = vmax.f32 %v416_v37, %v388_v34 }
  0xc3   : > { %v367_v31 = vpop.permute.xlu1 %366  ;;  %v363_v32 = vpop.permute.xlu0 %362  ;;  %713 = vmatpush3.bf16.msra.mxu0 (!%p642_p6), %v746_v13 }
  0xc4   : > { %v405_v38 = vadd.f32 %v683_v6, %v367_v31  ;;  %v404_v45 = vadd.f32 %v682_v8, %v363_v32  ;;  %714 = vmatprep.subr.bf16.mxu0 (!%p642_p6), %v789_v16 }
  0xc6   : > { %v440_v55 = vmax.f32 %v438_v48, %v405_v38  ;;  %v439_v51 = vmax.f32 %v437_v49, %v404_v45 }
  0xc7   : > { %v308_v44 = vpop.permute.xlu1 %307  ;;  %v304_v28 = vpop.permute.xlu0 %303  ;;  %715 = vmatpush3.bf16.msra.mxu0 (!%p642_p6), %v747_v18 }
  0xc8   : > { %v391_v46 = vadd.f32 %v687_v35, %v308_v44  ;;  %v390_v47 = vadd.f32 %v686_v36, %v304_v28  ;;  %716 = vmatprep.subr.bf16.mxu0 (!%p642_p6), %v789_v16 }
  0xca   : > { %v421_v50 = vmax.f32 %v419_v43, %v391_v46  ;;  %v420_v54 = vmax.f32 %v418_v29, %v390_v47 }
  0xcb   : > { %v375_v56 = vpop.permute.xlu1 %374  ;;  %v371_v58 = vpop.permute.xlu0 %370  ;;  %717 = vmatpush3.bf16.msra.mxu0 (!%p642_p6), %v748_v19 }
  0xcc   : > { %v422_v52 = vmax.f32 %v420_v54, %v421_v50  ;;  %v407_v53 = vadd.f32 %v687_v35, %v375_v56  ;;  %v406_v57 = vadd.f32 %v686_v36, %v371_v58  ;;  %718 = vmatprep.subr.bf16.mxu0 (!%p642_p6), %v789_v16 }
  0xce   : > { %v423_v59 = vrot.slane %v422_v52, 4  ;;  %v442_v60 = vmax.f32 %v440_v55, %v407_v53  ;;  %v441_v61 = vmax.f32 %v439_v51, %v406_v57 }
  0xcf   : > { %719 = vmatpush3.bf16.msra.mxu0 (!%p642_p6), %v749_v26 }
  0xd0   : > { %v424_v62 = vmax.f32 %v422_v52, %v423_v59  ;;  %v443_v63 = vmax.f32 %v441_v61, %v442_v60 }
  0xd2   : > { %v425_v0 = vrot.slane %v424_v62, 2  ;;  %v444_v1 = vrot.slane %v443_v63, 4 }
  0xd4   : > { %v426_v2 = vmax.f32 %v424_v62, %v425_v0  ;;  %v445_v3 = vmax.f32 %v443_v63, %v444_v1 }
  0xd6   : > { %v446_v4 = vrot.slane %v445_v3, 2  ;;  %v427_v5 = vrot.slane %v426_v2, 1 }
  0xd8   : > { %v447_v6 = vmax.f32 %v445_v3, %v446_v4  ;;  %v428_v8 = vmax.f32 %v426_v2, %v427_v5 }
  0xda   : > { %v448_v7 = vrot.slane %v447_v6, 1 }
  0xdb   : > { %461 = sbr.rel (%p642_p6) target bundleno = 450 (0x1c2), region = 44 }
  0xdc   : > { %v449_v10 = vmax.f32 %v447_v6, %v448_v7 }
  0xde   : > { %v454_v11 = vsel %vm453_vm0, %v449_v10, %v428_v8 }
  0xdf   : > { %v456_v14 = vmax.f32 %v450_v9, %v454_v11 }
  0xe1   : > { %457 = vst [vmem:[#allocation2] sm:$0x3] %v456_v14 }
  0xe8   : > { %v462_v21 = vld [vmem:[#allocation2] sm:$0x3] }
  0xe9   : > { %v463_v27 = vpack.c.bf16 %v462_v21, %v462_v21 }
  0xeb   : > { %721 = vmatmul.mubr.bf16.vlgmr.msra.gmra.mrb[0].mxu0 %v463_v27 }
 0x1be   : > { %v569_v30 = vpop.f32.mrb[0].mxu0 }
 0x1bf   : > { %v570_v31 = vadd.f32 %v643_v24, %v569_v30  ;;  %v722_v32 = vpop.f32.mrb[1].mxu0 }
 0x1c0   : > { %v572_v33 = vpop.f32.mrb[2].mxu0 }
 0x1c1   : > { %575 = vst [vmem:[#allocation3] sm:$0x3] %v570_v31  ;;  %v723_v34 = vpop.f32.mrb[3].mxu0 }
 0x1c2 PF: > { %p728_p7 = scmp.eq.s32.totalorder %s823_s16, 1  ;;  %s791_s21 = smov [#allocation3]  }
 0x1c3   : > { %s583_s22 = sshll.u32 %s791_s21, 4  ;;  %s584_s22 = int_to_ptr.vmem [resolvable:$true] %s583_s22 }
 0x1c4   : > { %s750_s23 = scalar_lea.vmem %s584_s22, 32  ;;  %p757_p11 = scmp.lt.s32.totalorder %s584_s22, %s584_s22 }
 0x1c5   : > { %p751_p8 = scmp.ne.s32.totalorder %s584_s22, %s750_s23  ;;  %p758_p12 = scmp.lt.s32.totalorder %s750_s23, %s750_s23 }
 0x1c7   : > { %p752_p9 = pnand %p751_p8, %p728_p7  ;;  %p759_p13 = por %p758_p12, %p757_p11 }
 0x1c9   : > { %p753_p10 = pneg %p752_p9 }
 0x1cb   : > { %p760_p0 = pnand %p759_p13, %p753_p10 }
 0x1cd   : > { %763 = shalt.err (!%p760_p0)
}
 0x1ce   : > { %s764_s26 = scalar_lea.hbm %s905_s4, 32 }
 0x1cf   : > { %p765_p1 = scmp.ne.s32.totalorder %s905_s4, %s764_s26  ;;  %p770_p4 = scmp.lt.u32.totalorder %s764_s26, %s905_s4 }
 0x1d1   : > { %p766_p2 = pnand %p765_p1, %p728_p7 }
 0x1d3   : > { %p767_p3 = pneg %p766_p2 }
 0x1d5   : > { %p772_p5 = pnand %p770_p4, %p767_p3 }
 0x1d7   : > { %775 = shalt.err (!%p772_p5)
}
 0x1d8   : > { %725 = dma.vmem_to_hbm [thread:$0]  (%p728_p7), %s584_s22, 32, %s905_s4, [#allocation4]  }
 0x1d9   : > { %781 = dma.done.wait (%p728_p7), [#allocation4], 32  }
 0x1da   : > { %783 = vsyncadd (%p728_p7), [#allocation4], 4294967264 }
 0x1db PF: > { %s15_s15 = sadd.s32 1, %s786_s15  }
 0x1dc   : > { %p12_p6 = scmp.ge.s32.totalorder %s15_s15, 4  }
 0x1de   :  { %14 = sbr.rel (!%p12_p6) target bundleno = 1 (0x1), region = 74 }
 0x1e5   :  { %596 = vsyncpa [#allocation4], 1 }
 0x1e6   :  { %598 = vsyncpa [#allocation4 + $0x1], 1 }

// kernel: gcn_forward.6
= control target key start
LH: loop header
LB: loop body
LE: loop exit
PB: predicated region body
PF: predicated region fallthrough
CT: control target
= control target key end

     0   :  { %s1172_s15 = smov 0   ;;  %s1296_s0 = inlined_call_operand.vmem [shape: bf16[256,256], index: 0, kind: input, shape index: {}]   ;;  %s1297_s1 = inlined_call_operand.vmem [shape: bf16[256,128], index: 1, kind: input, shape index: {}]   ;;  %s1298_s2 = inlined_call_operand.vmem [shape: bf16[128,128], index: 2, kind: input, shape index: {}]   ;;  %s1299_s3 = inlined_call_operand.vmem [shape: f32[1,128], index: 3, kind: input, shape index: {}]   ;;  %s1300_s4 = inlined_call_operand.vmem [shape: bf16[256,128], index: 4, kind: output, shape index: {}]  }
   0x1 LB: > { %s838_s16 = sadd.s32 4294967295, %s1145_s15   ;;  %p842_p0 = scmp.ge.s32.totalorder %s1145_s15, 1  ;;  %s1145_s15 = sphi %s1172_s15, %s14_s15  }
   0x2   : > { %p164_p1 = scmp.lt.s32.totalorder %s1145_s15, 3 }
   0x4   : > { %p165_p2 = pnand %p842_p0, %p164_p1 }
   0x5   : > { %v1091_v0 = vld [vmem:[%s1297_s1 + $0x40] sm:$0xff] (!%p165_p2)   ;;  %s843_s19 = sshll.u32 (!%p165_p2), %s838_s16, 4  ;;  %v1093_v2 = vld [vmem:[%s1297_s1 + $0x48] sm:$0xff] (!%p165_p2)   ;;  %v1095_v4 = vld [vmem:[%s1297_s1 + $0x50] sm:$0xff] (!%p165_p2)  }
   0x6   : > { %168 = sbr.rel (%p165_p2) target bundleno = 533 (0x215), region = 36  ;;  %v1092_v1 = vld [vmem:[%s1297_s1] sm:$0xff] (!%p165_p2)   ;;  %971 = vmatprep.subr.bf16.mxu0 (!%p165_p2), %v1091_v0  ;;  %v1094_v3 = vld [vmem:[%s1297_s1 + $0x8] sm:$0xff] (!%p165_p2)   ;;  %p192_p3 = scmp.lt.s32.totalorder (!%p165_p2), %s843_s19, 31  ;;  %v1096_v5 = vld [vmem:[%s1297_s1 + $0x10] sm:$0xff] (!%p165_p2)  }
   0x7   : > { %972 = vmatpush3.bf16.msra.mxu0 (!%p165_p2), %v1092_v1  ;;  %v1097_v6 = vld [vmem:[%s1297_s1 + $0x58] sm:$0xff] (!%p165_p2)   ;;  %v1099_v8 = vld [vmem:[%s1297_s1 + $0x60] sm:$0xff] (!%p165_p2)   ;;  %v1101_v10 = vld [vmem:[%s1297_s1 + $0x68] sm:$0xff] (!%p165_p2)  }
   0x8   : > { %973 = vmatprep.subr.bf16.mxu0 (!%p165_p2), %v1093_v2  ;;  %v1098_v7 = vld [vmem:[%s1297_s1 + $0x18] sm:$0xff] (!%p165_p2)   ;;  %v1100_v9 = vld [vmem:[%s1297_s1 + $0x20] sm:$0xff] (!%p165_p2)   ;;  %v1102_v12 = vld [vmem:[%s1297_s1 + $0x28] sm:$0xff] (!%p165_p2)  }
   0x9   : > { %v1103_v13 = vld [vmem:[%s1297_s1 + $0x70] sm:$0xff] (!%p165_p2)   ;;  %v1105_v15 = vld [vmem:[%s1297_s1 + $0x78] sm:$0xff] (!%p165_p2)   ;;  %v1131_v17 = vld [vmem:[%s1298_s2] sm:$0xff] (!%p165_p2)  }
   0xa   : > { %v1104_v14 = vld [vmem:[%s1297_s1 + $0x30] sm:$0xff] (!%p165_p2)   ;;  %v1106_v16 = vld [vmem:[%s1297_s1 + $0x38] sm:$0xff] (!%p165_p2)   ;;  %v1132_v19 = vld [vmem:[%s1298_s2 + $0x8] sm:$0xff] (!%p165_p2)   ;;  %1051 = vmatprep.subr.bf16.mxu1 (!%p165_p2), %v1131_v17 }
   0xb   : > { %974 = vmatpush3.bf16.msra.mxu0 (!%p165_p2), %v1094_v3  ;;  %1052 = vmatpush3.bf16.msra.mxu1 (!%p165_p2), %v1131_v17  ;;  %v1133_v21 = vld [vmem:[%s1298_s2 + $0x10] sm:$0xff] (!%p165_p2)   ;;  %v1134_v22 = vld [vmem:[%s1298_s2 + $0x18] sm:$0xff] (!%p165_p2)   ;;  %v1135_v36 = vld [vmem:[%s1298_s2 + $0x20] sm:$0xff] (!%p165_p2)  }
   0xc   : > { %975 = vmatprep.subr.bf16.mxu0 (!%p165_p2), %v1095_v4  ;;  %1053 = vmatprep.subr.bf16.mxu1 (!%p165_p2), %v1132_v19  ;;  %v1136_v37 = vld [vmem:[%s1298_s2 + $0x28] sm:$0xff] (!%p165_p2)   ;;  %v1137_v38 = vld [vmem:[%s1298_s2 + $0x30] sm:$0xff] (!%p165_p2)   ;;  %v1138_v39 = vld [vmem:[%s1298_s2 + $0x38] sm:$0xff] (!%p165_p2)  }
   0xd   : > { %s1302_s19 = smov (!%p192_p3, %s843_s19), 31 }
   0xe   : > { %s907_s8 = sshll.u32 %s1302_s19, 3  ;;  %s847_s24 = sshll.u32 %s1302_s19, 2 }
   0xf   : > { %976 = vmatpush3.bf16.msra.mxu0 %v1096_v5  ;;  %s1213_s13 = scalar_lea.vmem %s1296_s0, %s907_s8  ;;  %1054 = vmatpush3.bf16.msra.mxu1 %v1132_v19  ;;  %s1283_s27 = scalar_lea.vmem %s1300_s4, %s847_s24 }
  0x10   : > { %977 = vmatprep.subr.bf16.mxu0 %v1097_v6  ;;  %v1109_v11 = vld [vmem:[%s1213_s13 + $0x4] ss:$8 sps:$4 sm:$0xff]   ;;  %v1107_v18 = vld [vmem:[%s1213_s13] ss:$8 sps:$4 sm:$0xff]   ;;  %v1110_v20 = vld [vmem:[%s1213_s13 + $0x14] ss:$8 sps:$4 sm:$0xff]   ;;  %1055 = vmatprep.subr.bf16.mxu1 %v1133_v21 }
  0x11   : > { %461 = vmatprep.mubr.bf16.mxu0 %v1109_v11  ;;  %v1112_v23 = vld [vmem:[%s1213_s13 + $0x10] ss:$8 sps:$4 sm:$0xff]   ;;  %v1113_v24 = vld [vmem:[%s1213_s13 + $0x24] ss:$8 sps:$4 sm:$0xff]   ;;  %v1115_v25 = vld [vmem:[%s1213_s13 + $0x20] ss:$8 sps:$4 sm:$0xff]  }
  0x12   : > { %v1116_v26 = vld [vmem:[%s1213_s13 + $0x34] ss:$8 sps:$4 sm:$0xff]   ;;  %v1118_v27 = vld [vmem:[%s1213_s13 + $0x30] ss:$8 sps:$4 sm:$0xff]   ;;  %v1119_v28 = vld [vmem:[%s1213_s13 + $0x44] ss:$8 sps:$4 sm:$0xff]  }
  0x13   : > { %978 = vmatpush3.bf16.msra.mxu0 %v1098_v7  ;;  %1056 = vmatpush3.bf16.msra.mxu1 %v1133_v21  ;;  %v1121_v29 = vld [vmem:[%s1213_s13 + $0x40] ss:$8 sps:$4 sm:$0xff]   ;;  %v1122_v30 = vld [vmem:[%s1213_s13 + $0x54] ss:$8 sps:$4 sm:$0xff]   ;;  %v1124_v31 = vld [vmem:[%s1213_s13 + $0x50] ss:$8 sps:$4 sm:$0xff]  }
  0x14   : > { %979 = vmatprep.subr.bf16.mxu0 %v1099_v8  ;;  %1057 = vmatprep.subr.bf16.mxu1 %v1134_v22  ;;  %v1125_v32 = vld [vmem:[%s1213_s13 + $0x64] ss:$8 sps:$4 sm:$0xff]   ;;  %v1127_v33 = vld [vmem:[%s1213_s13 + $0x60] ss:$8 sps:$4 sm:$0xff]   ;;  %v1128_v34 = vld [vmem:[%s1213_s13 + $0x74] ss:$8 sps:$4 sm:$0xff]  }
  0x15   : > { %v1130_v35 = vld [vmem:[%s1213_s13 + $0x70] ss:$8 sps:$4 sm:$0xff]  }
  0x17   : > { %980 = vmatpush3.bf16.msra.mxu0 %v1100_v9  ;;  %1058 = vmatpush3.bf16.msra.mxu1 %v1134_v22 }
  0x18   : > { %981 = vmatprep.subr.bf16.mxu0 %v1101_v10  ;;  %1059 = vmatprep.subr.bf16.mxu1 %v1135_v36 }
  0x1b   : > { %982 = vmatpush3.bf16.msra.mxu0 %v1102_v12  ;;  %1060 = vmatpush3.bf16.msra.mxu1 %v1135_v36 }
  0x1c   : > { %983 = vmatprep.subr.bf16.mxu0 %v1103_v13  ;;  %1061 = vmatprep.subr.bf16.mxu1 %v1136_v37 }
  0x1f   : > { %984 = vmatpush3.bf16.msra.mxu0 %v1104_v14  ;;  %1062 = vmatpush3.bf16.msra.mxu1 %v1136_v37 }
  0x20   : > { %985 = vmatprep.subr.bf16.mxu0 %v1105_v15  ;;  %1063 = vmatprep.subr.bf16.mxu1 %v1137_v38 }
  0x23   : > { %986 = vmatpush3.bf16.msra.mxu0 %v1106_v16  ;;  %1064 = vmatpush3.bf16.msra.mxu1 %v1137_v38 }
  0x24   : > { %1065 = vmatprep.subr.bf16.mxu1 %v1138_v39 }
  0x26   : > { %462 = vmatmul.mubr.bf16.vlgmr.msra.gmra.mrb[0].mxu0 %v1107_v18 }
  0x27   : > { %469 = vmatprep.mubr.bf16.mxu0 %v1110_v20  ;;  %1066 = vmatpush3.bf16.msra.mxu1 %v1138_v39 }
  0x2e   : > { %470 = vmatmul.mubr.bf16.gmra.mrb[4].mxu0 %v1112_v23 }
  0x2f   : > { %477 = vmatprep.mubr.bf16.mxu0 %v1113_v24 }
  0x36   : > { %478 = vmatmul.mubr.bf16.gmra.mrb[8].mxu0 %v1115_v25 }
  0x37   : > { %485 = vmatprep.mubr.bf16.mxu0 %v1116_v26 }
  0x3e   : > { %486 = vmatmul.mubr.bf16.gmra.mrb[12].mxu0 %v1118_v27 }
  0x3f   : > { %493 = vmatprep.mubr.bf16.mxu0 %v1119_v28 }
  0x46   : > { %494 = vmatmul.mubr.bf16.gmra.mrb[16].mxu0 %v1121_v29 }
  0x47   : > { %501 = vmatprep.mubr.bf16.mxu0 %v1122_v30 }
  0x4e   : > { %502 = vmatmul.mubr.bf16.gmra.mrb[20].mxu0 %v1124_v31 }
  0x4f   : > { %509 = vmatprep.mubr.bf16.mxu0 %v1125_v32 }
  0x56   : > { %510 = vmatmul.mubr.bf16.gmra.mrb[24].mxu0 %v1127_v33  ;;  %v880_v33 = vld [vmem:[%s1299_s3] ss:$0 sm:$0xff] }
  0x57   : > { %517 = vmatprep.mubr.bf16.mxu0 %v1128_v34 }
  0x5e   : > { %518 = vmatmul.mubr.bf16.gmra.mrb[28].mxu0 %v1130_v35 }
  0xf9   : > { %v987_v40 = vpop.f32.mrb[0].mxu0 }
  0xfa   : > { %v988_v41 = vpop.f32.mrb[1].mxu0 }
  0xfb   : > { %v989_v42 = vadd.f32 %v988_v41, %v987_v40  ;;  %v990_v43 = vpop.f32.mrb[2].mxu0 }
  0xfc   : > { %v991_v44 = vpop.f32.mrb[3].mxu0 }
  0xfd   : > { %v992_v45 = vadd.f32 %v991_v44, %v990_v43 }
  0xff   : > { %v526_v46 = vpack.c.bf16 %v992_v45, %v989_v42 }
 0x101   : > { %v993_v47 = vpop.f32.mrb[4].mxu0  ;;  %1067 = vmatprep.mubr.bf16.mxu1 %v526_v46 }
 0x102   : > { %v994_v48 = vpop.f32.mrb[5].mxu0 }
 0x103   : > { %v995_v49 = vadd.f32 %v994_v48, %v993_v47  ;;  %v996_v50 = vpop.f32.mrb[6].mxu0 }
 0x104   : > { %v997_v51 = vpop.f32.mrb[7].mxu0 }
 0x105   : > { %v998_v52 = vadd.f32 %v997_v51, %v996_v50 }
 0x107   : > { %v527_v53 = vpack.c.bf16 %v998_v52, %v995_v49 }
 0x109   : > { %v999_v54 = vpop.f32.mrb[8].mxu0  ;;  %1068 = vmatmul.mubr.bf16.vlgmr.msra.gmra.mrb[0].mxu1 %v527_v53 }
 0x10a   : > { %v1000_v55 = vpop.f32.mrb[9].mxu0 }
 0x10b   : > { %v1001_v56 = vadd.f32 %v1000_v55, %v999_v54  ;;  %v1002_v57 = vpop.f32.mrb[10].mxu0 }
 0x10c   : > { %v1003_v58 = vpop.f32.mrb[11].mxu0 }
 0x10d   : > { %v1004_v59 = vadd.f32 %v1003_v58, %v1002_v57 }
 0x10f   : > { %v528_v60 = vpack.c.bf16 %v1004_v59, %v1001_v56 }
 0x111   : > { %v1005_v61 = vpop.f32.mrb[12].mxu0  ;;  %1071 = vmatprep.mubr.bf16.mxu1 %v528_v60 }
 0x112   : > { %v1006_v62 = vpop.f32.mrb[13].mxu0 }
 0x113   : > { %v1007_v63 = vadd.f32 %v1006_v62, %v1005_v61  ;;  %v1008_v0 = vpop.f32.mrb[14].mxu0 }
 0x114   : > { %v1009_v1 = vpop.f32.mrb[15].mxu0 }
 0x115   : > { %v1010_v2 = vadd.f32 %v1009_v1, %v1008_v0 }
 0x117   : > { %v529_v3 = vpack.c.bf16 %v1010_v2, %v1007_v63 }
 0x119   : > { %v1011_v4 = vpop.f32.mrb[16].mxu0  ;;  %1072 = vmatmul.mubr.bf16.gmra.mrb[4].mxu1 %v529_v3 }
 0x11a   : > { %v1012_v5 = vpop.f32.mrb[17].mxu0 }
 0x11b   : > { %v1013_v6 = vadd.f32 %v1012_v5, %v1011_v4  ;;  %v1014_v7 = vpop.f32.mrb[18].mxu0 }
 0x11c   : > { %v1015_v8 = vpop.f32.mrb[19].mxu0 }
 0x11d   : > { %v1016_v9 = vadd.f32 %v1015_v8, %v1014_v7 }
 0x11f   : > { %v530_v10 = vpack.c.bf16 %v1016_v9, %v1013_v6 }
 0x121   : > { %v1017_v11 = vpop.f32.mrb[20].mxu0  ;;  %1075 = vmatprep.mubr.bf16.mxu1 %v530_v10 }
 0x122   : > { %v1018_v12 = vpop.f32.mrb[21].mxu0 }
 0x123   : > { %v1019_v13 = vadd.f32 %v1018_v12, %v1017_v11  ;;  %v1020_v14 = vpop.f32.mrb[22].mxu0 }
 0x124   : > { %v1021_v15 = vpop.f32.mrb[23].mxu0 }
 0x125   : > { %v1022_v16 = vadd.f32 %v1021_v15, %v1020_v14 }
 0x127   : > { %v531_v17 = vpack.c.bf16 %v1022_v16, %v1019_v13 }
 0x129   : > { %v1023_v18 = vpop.f32.mrb[24].mxu0  ;;  %1076 = vmatmul.mubr.bf16.gmra.mrb[8].mxu1 %v531_v17 }
 0x12a   : > { %v1024_v19 = vpop.f32.mrb[25].mxu0 }
 0x12b   : > { %v1025_v20 = vadd.f32 %v1024_v19, %v1023_v18  ;;  %v1026_v21 = vpop.f32.mrb[26].mxu0 }
 0x12c   : > { %v1027_v22 = vpop.f32.mrb[27].mxu0 }
 0x12d   : > { %v1028_v23 = vadd.f32 %v1027_v22, %v1026_v21 }
 0x12f   : > { %v532_v24 = vpack.c.bf16 %v1028_v23, %v1025_v20 }
 0x131   : > { %v1029_v25 = vpop.f32.mrb[28].mxu0  ;;  %1079 = vmatprep.mubr.bf16.mxu1 %v532_v24 }
 0x132   : > { %v1030_v26 = vpop.f32.mrb[29].mxu0 }
 0x133   : > { %v1031_v27 = vadd.f32 %v1030_v26, %v1029_v25  ;;  %v1032_v28 = vpop.f32.mrb[30].mxu0 }
 0x134   : > { %v1033_v29 = vpop.f32.mrb[31].mxu0 }
 0x135   : > { %v1034_v30 = vadd.f32 %v1033_v29, %v1032_v28 }
 0x137   : > { %v533_v31 = vpack.c.bf16 %v1034_v30, %v1031_v27 }
 0x139   : > { %1080 = vmatmul.mubr.bf16.gmra.mrb[12].mxu1 %v533_v31 }
 0x1dc   : > { %v1069_v32 = vpop.f32.mrb[0].mxu1 }
 0x1dd   : > { %v639_v34 = vpop.f32.mrb[1].mxu1  ;;  %v648_v36 = vadd.f32 %v1069_v32, %v880_v33 }
 0x1de   : > { %v1070_v35 = vpop.f32.mrb[2].mxu1  ;;  %v640_v39 = vadd.f32 %v880_v33, %v639_v34 }
 0x1df   : > { %v651_v37 = vadd.f32 %v1070_v35, %v880_v33  ;;  %v642_v38 = vpop.f32.mrb[3].mxu1 }
 0x1e0   : > { %v643_v40 = vadd.f32 %v880_v33, %v642_v38 }
 0x1e1   : > { %v932_v41 = vpack.c.bf16 %v651_v37, %v648_v36 }
 0x1e2   : > { %v927_v42 = vpack.c.bf16 %v643_v40, %v640_v39 }
 0x1e3   : > { %964 = vst [vmem:[%s1283_s27 + $0x8] sm:$0xff] %v932_v41  }
 0x1e4   : > { %928 = vst [vmem:[%s1283_s27] sm:$0xff] %v927_v42  }
 0x1ec   : > { %v1073_v43 = vpop.f32.mrb[4].mxu1 }
 0x1ed   : > { %v655_v44 = vpop.f32.mrb[5].mxu1  ;;  %v664_v46 = vadd.f32 %v1073_v43, %v880_v33 }
 0x1ee   : > { %v1074_v45 = vpop.f32.mrb[6].mxu1  ;;  %v656_v49 = vadd.f32 %v880_v33, %v655_v44 }
 0x1ef   : > { %v667_v47 = vadd.f32 %v1074_v45, %v880_v33  ;;  %v658_v48 = vpop.f32.mrb[7].mxu1 }
 0x1f0   : > { %v659_v50 = vadd.f32 %v880_v33, %v658_v48 }
 0x1f1   : > { %v942_v51 = vpack.c.bf16 %v667_v47, %v664_v46 }
 0x1f2   : > { %v937_v52 = vpack.c.bf16 %v659_v50, %v656_v49 }
 0x1f3   : > { %966 = vst [vmem:[%s1283_s27 + $0x18] sm:$0xff] %v942_v51  }
 0x1f4   : > { %965 = vst [vmem:[%s1283_s27 + $0x10] sm:$0xff] %v937_v52  }
 0x1fc   : > { %v1077_v53 = vpop.f32.mrb[8].mxu1 }
 0x1fd   : > { %v671_v54 = vpop.f32.mrb[9].mxu1  ;;  %v680_v56 = vadd.f32 %v1077_v53, %v880_v33 }
 0x1fe   : > { %v1078_v55 = vpop.f32.mrb[10].mxu1  ;;  %v672_v59 = vadd.f32 %v880_v33, %v671_v54 }
 0x1ff   : > { %v683_v57 = vadd.f32 %v1078_v55, %v880_v33  ;;  %v674_v58 = vpop.f32.mrb[11].mxu1 }
 0x200   : > { %v675_v60 = vadd.f32 %v880_v33, %v674_v58 }
 0x201   : > { %v952_v61 = vpack.c.bf16 %v683_v57, %v680_v56 }
 0x202   : > { %v947_v62 = vpack.c.bf16 %v675_v60, %v672_v59 }
 0x203   : > { %968 = vst [vmem:[%s1283_s27 + $0x28] sm:$0xff] %v952_v61  }
 0x204   : > { %967 = vst [vmem:[%s1283_s27 + $0x20] sm:$0xff] %v947_v62  }
 0x20c   : > { %v1081_v63 = vpop.f32.mrb[12].mxu1 }
 0x20d   : > { %v687_v0 = vpop.f32.mrb[13].mxu1  ;;  %v696_v2 = vadd.f32 %v1081_v63, %v880_v33 }
 0x20e   : > { %v1082_v1 = vpop.f32.mrb[14].mxu1  ;;  %v688_v5 = vadd.f32 %v880_v33, %v687_v0 }
 0x20f   : > { %v699_v3 = vadd.f32 %v1082_v1, %v880_v33  ;;  %v690_v4 = vpop.f32.mrb[15].mxu1 }
 0x210   : > { %v691_v6 = vadd.f32 %v880_v33, %v690_v4 }
 0x211   : > { %v962_v7 = vpack.c.bf16 %v699_v3, %v696_v2 }
 0x212   : > { %v957_v8 = vpack.c.bf16 %v691_v6, %v688_v5 }
 0x213   : > { %970 = vst [vmem:[%s1283_s27 + $0x38] sm:$0xff] %v962_v7  }
 0x214   : > { %969 = vst [vmem:[%s1283_s27 + $0x30] sm:$0xff] %v957_v8  }
 0x215 PF: > { %s14_s15 = sadd.s32 1, %s1145_s15  }
 0x216   : > { %p11_p4 = scmp.ge.s32.totalorder %s14_s15, 4  }
 0x218   :  { %13 = sbr.rel (!%p11_p4) target bundleno = 1 (0x1), region = 66 }

// kernel: gcn_forward.4
= control target key start
LH: loop header
LB: loop body
LE: loop exit
PB: predicated region body
PF: predicated region fallthrough
CT: control target
= control target key end

     0   :  { %s1188_s15 = smov 0   ;;  %s1312_s0 = inlined_call_operand.vmem [shape: bf16[256,256], index: 0, kind: input, shape index: {}]   ;;  %s1313_s1 = inlined_call_operand.vmem [shape: bf16[256,128], index: 1, kind: input, shape index: {}]   ;;  %s1314_s2 = inlined_call_operand.vmem [shape: bf16[128,128], index: 2, kind: input, shape index: {}]   ;;  %s1315_s3 = inlined_call_operand.vmem [shape: f32[1,128], index: 3, kind: input, shape index: {}]   ;;  %s1316_s4 = inlined_call_operand.vmem [shape: bf16[256,128], index: 4, kind: output, shape index: {}]  }
   0x1 LB: > { %s854_s16 = sadd.s32 4294967295, %s1161_s15   ;;  %p858_p0 = scmp.ge.s32.totalorder %s1161_s15, 1  ;;  %s1161_s15 = sphi %s1188_s15, %s14_s15  }
   0x2   : > { %p164_p1 = scmp.lt.s32.totalorder %s1161_s15, 3 }
   0x4   : > { %p165_p2 = pnand %p858_p0, %p164_p1 }
   0x5   : > { %v1107_v0 = vld [vmem:[%s1313_s1 + $0x40] sm:$0xff] (!%p165_p2)   ;;  %s859_s19 = sshll.u32 (!%p165_p2), %s854_s16, 4  ;;  %v1109_v2 = vld [vmem:[%s1313_s1 + $0x48] sm:$0xff] (!%p165_p2)   ;;  %v1111_v4 = vld [vmem:[%s1313_s1 + $0x50] sm:$0xff] (!%p165_p2)  }
   0x6   : > { %168 = sbr.rel (%p165_p2) target bundleno = 535 (0x217), region = 36  ;;  %v1108_v1 = vld [vmem:[%s1313_s1] sm:$0xff] (!%p165_p2)   ;;  %987 = vmatprep.subr.bf16.mxu0 (!%p165_p2), %v1107_v0  ;;  %v1110_v3 = vld [vmem:[%s1313_s1 + $0x8] sm:$0xff] (!%p165_p2)   ;;  %p192_p3 = scmp.lt.s32.totalorder (!%p165_p2), %s859_s19, 31  ;;  %v1112_v5 = vld [vmem:[%s1313_s1 + $0x10] sm:$0xff] (!%p165_p2)  }
   0x7   : > { %988 = vmatpush3.bf16.msra.mxu0 (!%p165_p2), %v1108_v1  ;;  %v1113_v6 = vld [vmem:[%s1313_s1 + $0x58] sm:$0xff] (!%p165_p2)   ;;  %v1115_v8 = vld [vmem:[%s1313_s1 + $0x60] sm:$0xff] (!%p165_p2)   ;;  %v1117_v10 = vld [vmem:[%s1313_s1 + $0x68] sm:$0xff] (!%p165_p2)  }
   0x8   : > { %989 = vmatprep.subr.bf16.mxu0 (!%p165_p2), %v1109_v2  ;;  %v1114_v7 = vld [vmem:[%s1313_s1 + $0x18] sm:$0xff] (!%p165_p2)   ;;  %v1116_v9 = vld [vmem:[%s1313_s1 + $0x20] sm:$0xff] (!%p165_p2)   ;;  %v1118_v12 = vld [vmem:[%s1313_s1 + $0x28] sm:$0xff] (!%p165_p2)  }
   0x9   : > { %v1119_v13 = vld [vmem:[%s1313_s1 + $0x70] sm:$0xff] (!%p165_p2)   ;;  %v1121_v15 = vld [vmem:[%s1313_s1 + $0x78] sm:$0xff] (!%p165_p2)   ;;  %v1147_v17 = vld [vmem:[%s1314_s2] sm:$0xff] (!%p165_p2)  }
   0xa   : > { %v1120_v14 = vld [vmem:[%s1313_s1 + $0x30] sm:$0xff] (!%p165_p2)   ;;  %v1122_v16 = vld [vmem:[%s1313_s1 + $0x38] sm:$0xff] (!%p165_p2)   ;;  %v1148_v19 = vld [vmem:[%s1314_s2 + $0x8] sm:$0xff] (!%p165_p2)   ;;  %1067 = vmatprep.subr.bf16.mxu1 (!%p165_p2), %v1147_v17 }
   0xb   : > { %990 = vmatpush3.bf16.msra.mxu0 (!%p165_p2), %v1110_v3  ;;  %1068 = vmatpush3.bf16.msra.mxu1 (!%p165_p2), %v1147_v17  ;;  %v1149_v21 = vld [vmem:[%s1314_s2 + $0x10] sm:$0xff] (!%p165_p2)   ;;  %v1150_v22 = vld [vmem:[%s1314_s2 + $0x18] sm:$0xff] (!%p165_p2)   ;;  %v1151_v36 = vld [vmem:[%s1314_s2 + $0x20] sm:$0xff] (!%p165_p2)  }
   0xc   : > { %991 = vmatprep.subr.bf16.mxu0 (!%p165_p2), %v1111_v4  ;;  %1069 = vmatprep.subr.bf16.mxu1 (!%p165_p2), %v1148_v19  ;;  %v1152_v37 = vld [vmem:[%s1314_s2 + $0x28] sm:$0xff] (!%p165_p2)   ;;  %v1153_v38 = vld [vmem:[%s1314_s2 + $0x30] sm:$0xff] (!%p165_p2)   ;;  %v1154_v39 = vld [vmem:[%s1314_s2 + $0x38] sm:$0xff] (!%p165_p2)  }
   0xd   : > { %s1318_s19 = smov (!%p192_p3, %s859_s19), 31 }
   0xe   : > { %s923_s8 = sshll.u32 %s1318_s19, 3  ;;  %s863_s24 = sshll.u32 %s1318_s19, 2 }
   0xf   : > { %992 = vmatpush3.bf16.msra.mxu0 %v1112_v5  ;;  %s1229_s13 = scalar_lea.vmem %s1312_s0, %s923_s8  ;;  %1070 = vmatpush3.bf16.msra.mxu1 %v1148_v19  ;;  %s1299_s27 = scalar_lea.vmem %s1316_s4, %s863_s24 }
  0x10   : > { %993 = vmatprep.subr.bf16.mxu0 %v1113_v6  ;;  %v1125_v11 = vld [vmem:[%s1229_s13 + $0x4] ss:$8 sps:$4 sm:$0xff]   ;;  %v1123_v18 = vld [vmem:[%s1229_s13] ss:$8 sps:$4 sm:$0xff]   ;;  %v1126_v20 = vld [vmem:[%s1229_s13 + $0x14] ss:$8 sps:$4 sm:$0xff]   ;;  %1071 = vmatprep.subr.bf16.mxu1 %v1149_v21 }
  0x11   : > { %461 = vmatprep.mubr.bf16.mxu0 %v1125_v11  ;;  %v1128_v23 = vld [vmem:[%s1229_s13 + $0x10] ss:$8 sps:$4 sm:$0xff]   ;;  %v1129_v24 = vld [vmem:[%s1229_s13 + $0x24] ss:$8 sps:$4 sm:$0xff]   ;;  %v1131_v25 = vld [vmem:[%s1229_s13 + $0x20] ss:$8 sps:$4 sm:$0xff]  }
  0x12   : > { %v1132_v26 = vld [vmem:[%s1229_s13 + $0x34] ss:$8 sps:$4 sm:$0xff]   ;;  %v1134_v27 = vld [vmem:[%s1229_s13 + $0x30] ss:$8 sps:$4 sm:$0xff]   ;;  %v1135_v28 = vld [vmem:[%s1229_s13 + $0x44] ss:$8 sps:$4 sm:$0xff]  }
  0x13   : > { %994 = vmatpush3.bf16.msra.mxu0 %v1114_v7  ;;  %1072 = vmatpush3.bf16.msra.mxu1 %v1149_v21  ;;  %v1137_v29 = vld [vmem:[%s1229_s13 + $0x40] ss:$8 sps:$4 sm:$0xff]   ;;  %v1138_v30 = vld [vmem:[%s1229_s13 + $0x54] ss:$8 sps:$4 sm:$0xff]   ;;  %v1140_v31 = vld [vmem:[%s1229_s13 + $0x50] ss:$8 sps:$4 sm:$0xff]  }
  0x14   : > { %995 = vmatprep.subr.bf16.mxu0 %v1115_v8  ;;  %1073 = vmatprep.subr.bf16.mxu1 %v1150_v22  ;;  %v1141_v32 = vld [vmem:[%s1229_s13 + $0x64] ss:$8 sps:$4 sm:$0xff]   ;;  %v1143_v33 = vld [vmem:[%s1229_s13 + $0x60] ss:$8 sps:$4 sm:$0xff]   ;;  %v1144_v34 = vld [vmem:[%s1229_s13 + $0x74] ss:$8 sps:$4 sm:$0xff]  }
  0x15   : > { %v1146_v35 = vld [vmem:[%s1229_s13 + $0x70] ss:$8 sps:$4 sm:$0xff]  }
  0x17   : > { %996 = vmatpush3.bf16.msra.mxu0 %v1116_v9  ;;  %1074 = vmatpush3.bf16.msra.mxu1 %v1150_v22 }
  0x18   : > { %997 = vmatprep.subr.bf16.mxu0 %v1117_v10  ;;  %1075 = vmatprep.subr.bf16.mxu1 %v1151_v36 }
  0x1b   : > { %998 = vmatpush3.bf16.msra.mxu0 %v1118_v12  ;;  %1076 = vmatpush3.bf16.msra.mxu1 %v1151_v36 }
  0x1c   : > { %999 = vmatprep.subr.bf16.mxu0 %v1119_v13  ;;  %1077 = vmatprep.subr.bf16.mxu1 %v1152_v37 }
  0x1f   : > { %1000 = vmatpush3.bf16.msra.mxu0 %v1120_v14  ;;  %1078 = vmatpush3.bf16.msra.mxu1 %v1152_v37 }
  0x20   : > { %1001 = vmatprep.subr.bf16.mxu0 %v1121_v15  ;;  %1079 = vmatprep.subr.bf16.mxu1 %v1153_v38 }
  0x23   : > { %1002 = vmatpush3.bf16.msra.mxu0 %v1122_v16  ;;  %1080 = vmatpush3.bf16.msra.mxu1 %v1153_v38 }
  0x24   : > { %1081 = vmatprep.subr.bf16.mxu1 %v1154_v39 }
  0x26   : > { %462 = vmatmul.mubr.bf16.vlgmr.msra.gmra.mrb[0].mxu0 %v1123_v18 }
  0x27   : > { %469 = vmatprep.mubr.bf16.mxu0 %v1126_v20  ;;  %1082 = vmatpush3.bf16.msra.mxu1 %v1154_v39 }
  0x2e   : > { %470 = vmatmul.mubr.bf16.gmra.mrb[4].mxu0 %v1128_v23 }
  0x2f   : > { %477 = vmatprep.mubr.bf16.mxu0 %v1129_v24 }
  0x36   : > { %478 = vmatmul.mubr.bf16.gmra.mrb[8].mxu0 %v1131_v25 }
  0x37   : > { %485 = vmatprep.mubr.bf16.mxu0 %v1132_v26 }
  0x3e   : > { %486 = vmatmul.mubr.bf16.gmra.mrb[12].mxu0 %v1134_v27 }
  0x3f   : > { %493 = vmatprep.mubr.bf16.mxu0 %v1135_v28 }
  0x46   : > { %494 = vmatmul.mubr.bf16.gmra.mrb[16].mxu0 %v1137_v29 }
  0x47   : > { %501 = vmatprep.mubr.bf16.mxu0 %v1138_v30 }
  0x4e   : > { %502 = vmatmul.mubr.bf16.gmra.mrb[20].mxu0 %v1140_v31 }
  0x4f   : > { %509 = vmatprep.mubr.bf16.mxu0 %v1141_v32  ;;  %v896_v32 = vld [vmem:[%s1315_s3] ss:$0 sm:$0xff] }
  0x56   : > { %510 = vmatmul.mubr.bf16.gmra.mrb[24].mxu0 %v1143_v33 }
  0x57   : > { %517 = vmatprep.mubr.bf16.mxu0 %v1144_v34 }
  0x5e   : > { %518 = vmatmul.mubr.bf16.gmra.mrb[28].mxu0 %v1146_v35 }
  0xf9   : > { %v1003_v40 = vpop.f32.mrb[0].mxu0 }
  0xfa   : > { %v1004_v41 = vpop.f32.mrb[1].mxu0 }
  0xfb   : > { %v1005_v42 = vadd.f32 %v1004_v41, %v1003_v40  ;;  %v1006_v43 = vpop.f32.mrb[2].mxu0 }
  0xfc   : > { %v1007_v44 = vpop.f32.mrb[3].mxu0 }
  0xfd   : > { %v1008_v45 = vadd.f32 %v1007_v44, %v1006_v43 }
  0xff   : > { %v526_v46 = vpack.c.bf16 %v1008_v45, %v1005_v42 }
 0x101   : > { %v1009_v47 = vpop.f32.mrb[4].mxu0  ;;  %1083 = vmatprep.mubr.bf16.mxu1 %v526_v46 }
 0x102   : > { %v1010_v48 = vpop.f32.mrb[5].mxu0 }
 0x103   : > { %v1011_v49 = vadd.f32 %v1010_v48, %v1009_v47  ;;  %v1012_v50 = vpop.f32.mrb[6].mxu0 }
 0x104   : > { %v1013_v51 = vpop.f32.mrb[7].mxu0 }
 0x105   : > { %v1014_v52 = vadd.f32 %v1013_v51, %v1012_v50 }
 0x107   : > { %v527_v53 = vpack.c.bf16 %v1014_v52, %v1011_v49 }
 0x109   : > { %v1015_v54 = vpop.f32.mrb[8].mxu0  ;;  %1084 = vmatmul.mubr.bf16.vlgmr.msra.gmra.mrb[0].mxu1 %v527_v53 }
 0x10a   : > { %v1016_v55 = vpop.f32.mrb[9].mxu0 }
 0x10b   : > { %v1017_v56 = vadd.f32 %v1016_v55, %v1015_v54  ;;  %v1018_v57 = vpop.f32.mrb[10].mxu0 }
 0x10c   : > { %v1019_v58 = vpop.f32.mrb[11].mxu0 }
 0x10d   : > { %v1020_v59 = vadd.f32 %v1019_v58, %v1018_v57 }
 0x10f   : > { %v528_v60 = vpack.c.bf16 %v1020_v59, %v1017_v56 }
 0x111   : > { %v1021_v61 = vpop.f32.mrb[12].mxu0  ;;  %1087 = vmatprep.mubr.bf16.mxu1 %v528_v60 }
 0x112   : > { %v1022_v62 = vpop.f32.mrb[13].mxu0 }
 0x113   : > { %v1023_v63 = vadd.f32 %v1022_v62, %v1021_v61  ;;  %v1024_v0 = vpop.f32.mrb[14].mxu0 }
 0x114   : > { %v1025_v1 = vpop.f32.mrb[15].mxu0 }
 0x115   : > { %v1026_v2 = vadd.f32 %v1025_v1, %v1024_v0 }
 0x117   : > { %v529_v3 = vpack.c.bf16 %v1026_v2, %v1023_v63 }
 0x119   : > { %v1027_v4 = vpop.f32.mrb[16].mxu0  ;;  %1088 = vmatmul.mubr.bf16.gmra.mrb[4].mxu1 %v529_v3 }
 0x11a   : > { %v1028_v5 = vpop.f32.mrb[17].mxu0 }
 0x11b   : > { %v1029_v6 = vadd.f32 %v1028_v5, %v1027_v4  ;;  %v1030_v7 = vpop.f32.mrb[18].mxu0 }
 0x11c   : > { %v1031_v8 = vpop.f32.mrb[19].mxu0 }
 0x11d   : > { %v1032_v9 = vadd.f32 %v1031_v8, %v1030_v7 }
 0x11f   : > { %v530_v10 = vpack.c.bf16 %v1032_v9, %v1029_v6 }
 0x121   : > { %v1033_v11 = vpop.f32.mrb[20].mxu0  ;;  %1091 = vmatprep.mubr.bf16.mxu1 %v530_v10 }
 0x122   : > { %v1034_v12 = vpop.f32.mrb[21].mxu0 }
 0x123   : > { %v1035_v13 = vadd.f32 %v1034_v12, %v1033_v11  ;;  %v1036_v14 = vpop.f32.mrb[22].mxu0 }
 0x124   : > { %v1037_v15 = vpop.f32.mrb[23].mxu0 }
 0x125   : > { %v1038_v16 = vadd.f32 %v1037_v15, %v1036_v14 }
 0x127   : > { %v531_v17 = vpack.c.bf16 %v1038_v16, %v1035_v13 }
 0x129   : > { %v1039_v18 = vpop.f32.mrb[24].mxu0  ;;  %1092 = vmatmul.mubr.bf16.gmra.mrb[8].mxu1 %v531_v17 }
 0x12a   : > { %v1040_v19 = vpop.f32.mrb[25].mxu0 }
 0x12b   : > { %v1041_v20 = vadd.f32 %v1040_v19, %v1039_v18  ;;  %v1042_v21 = vpop.f32.mrb[26].mxu0 }
 0x12c   : > { %v1043_v22 = vpop.f32.mrb[27].mxu0 }
 0x12d   : > { %v1044_v23 = vadd.f32 %v1043_v22, %v1042_v21 }
 0x12f   : > { %v532_v24 = vpack.c.bf16 %v1044_v23, %v1041_v20 }
 0x131   : > { %v1045_v25 = vpop.f32.mrb[28].mxu0  ;;  %1095 = vmatprep.mubr.bf16.mxu1 %v532_v24 }
 0x132   : > { %v1046_v26 = vpop.f32.mrb[29].mxu0 }
 0x133   : > { %v1047_v27 = vadd.f32 %v1046_v26, %v1045_v25  ;;  %v1048_v28 = vpop.f32.mrb[30].mxu0 }
 0x134   : > { %v1049_v29 = vpop.f32.mrb[31].mxu0 }
 0x135   : > { %v1050_v30 = vadd.f32 %v1049_v29, %v1048_v28 }
 0x137   : > { %v533_v31 = vpack.c.bf16 %v1050_v30, %v1047_v27 }
 0x139   : > { %1096 = vmatmul.mubr.bf16.gmra.mrb[12].mxu1 %v533_v31 }
 0x1dc   : > { %v1085_v33 = vpop.f32.mrb[0].mxu1 }
 0x1dd   : > { %v648_v34 = vadd.f32 %v1085_v33, %v896_v32  ;;  %v639_v35 = vpop.f32.mrb[1].mxu1 }
 0x1de   : > { %v640_v36 = vadd.f32 %v896_v32, %v639_v35  ;;  %v1086_v37 = vpop.f32.mrb[2].mxu1 }
 0x1df   : > { %v651_v38 = vadd.f32 %v1086_v37, %v896_v32  ;;  %v642_v39 = vpop.f32.mrb[3].mxu1  ;;  %v704_v41 = vmax.f32 %v648_v34, 0.0 }
 0x1e0   : > { %v643_v40 = vadd.f32 %v896_v32, %v642_v39  ;;  %v702_v43 = vmax.f32 %v640_v36, 0.0 }
 0x1e1   : > { %v705_v42 = vmax.f32 %v651_v38, 0.0 }
 0x1e2   : > { %v703_v44 = vmax.f32 %v643_v40, 0.0 }
 0x1e3   : > { %v948_v45 = vpack.c.bf16 %v705_v42, %v704_v41 }
 0x1e4   : > { %v943_v46 = vpack.c.bf16 %v703_v44, %v702_v43 }
 0x1e5   : > { %980 = vst [vmem:[%s1299_s27 + $0x8] sm:$0xff] %v948_v45  }
 0x1e6   : > { %944 = vst [vmem:[%s1299_s27] sm:$0xff] %v943_v46  }
 0x1ec   : > { %v1089_v47 = vpop.f32.mrb[4].mxu1 }
 0x1ed   : > { %v664_v48 = vadd.f32 %v1089_v47, %v896_v32  ;;  %v655_v49 = vpop.f32.mrb[5].mxu1 }
 0x1ee   : > { %v656_v50 = vadd.f32 %v896_v32, %v655_v49  ;;  %v1090_v51 = vpop.f32.mrb[6].mxu1 }
 0x1ef   : > { %v667_v52 = vadd.f32 %v1090_v51, %v896_v32  ;;  %v658_v53 = vpop.f32.mrb[7].mxu1  ;;  %v708_v55 = vmax.f32 %v664_v48, 0.0 }
 0x1f0   : > { %v659_v54 = vadd.f32 %v896_v32, %v658_v53  ;;  %v706_v57 = vmax.f32 %v656_v50, 0.0 }
 0x1f1   : > { %v709_v56 = vmax.f32 %v667_v52, 0.0 }
 0x1f2   : > { %v707_v58 = vmax.f32 %v659_v54, 0.0 }
 0x1f3   : > { %v958_v59 = vpack.c.bf16 %v709_v56, %v708_v55 }
 0x1f4   : > { %v953_v60 = vpack.c.bf16 %v707_v58, %v706_v57 }
 0x1f5   : > { %982 = vst [vmem:[%s1299_s27 + $0x18] sm:$0xff] %v958_v59  }
 0x1f6   : > { %981 = vst [vmem:[%s1299_s27 + $0x10] sm:$0xff] %v953_v60  }
 0x1fc   : > { %v1093_v61 = vpop.f32.mrb[8].mxu1 }
 0x1fd   : > { %v680_v62 = vadd.f32 %v1093_v61, %v896_v32  ;;  %v671_v63 = vpop.f32.mrb[9].mxu1 }
 0x1fe   : > { %v672_v0 = vadd.f32 %v896_v32, %v671_v63  ;;  %v1094_v1 = vpop.f32.mrb[10].mxu1 }
 0x1ff   : > { %v683_v2 = vadd.f32 %v1094_v1, %v896_v32  ;;  %v674_v3 = vpop.f32.mrb[11].mxu1  ;;  %v712_v5 = vmax.f32 %v680_v62, 0.0 }
 0x200   : > { %v675_v4 = vadd.f32 %v896_v32, %v674_v3  ;;  %v710_v7 = vmax.f32 %v672_v0, 0.0 }
 0x201   : > { %v713_v6 = vmax.f32 %v683_v2, 0.0 }
 0x202   : > { %v711_v8 = vmax.f32 %v675_v4, 0.0 }
 0x203   : > { %v968_v9 = vpack.c.bf16 %v713_v6, %v712_v5 }
 0x204   : > { %v963_v10 = vpack.c.bf16 %v711_v8, %v710_v7 }
 0x205   : > { %984 = vst [vmem:[%s1299_s27 + $0x28] sm:$0xff] %v968_v9  }
 0x206   : > { %983 = vst [vmem:[%s1299_s27 + $0x20] sm:$0xff] %v963_v10  }
 0x20c   : > { %v1097_v11 = vpop.f32.mrb[12].mxu1 }
 0x20d   : > { %v696_v12 = vadd.f32 %v1097_v11, %v896_v32  ;;  %v687_v13 = vpop.f32.mrb[13].mxu1 }
 0x20e   : > { %v688_v14 = vadd.f32 %v896_v32, %v687_v13  ;;  %v1098_v15 = vpop.f32.mrb[14].mxu1 }
 0x20f   : > { %v699_v16 = vadd.f32 %v1098_v15, %v896_v32  ;;  %v690_v17 = vpop.f32.mrb[15].mxu1  ;;  %v716_v19 = vmax.f32 %v696_v12, 0.0 }
 0x210   : > { %v691_v18 = vadd.f32 %v896_v32, %v690_v17  ;;  %v714_v21 = vmax.f32 %v688_v14, 0.0 }
 0x211   : > { %v717_v20 = vmax.f32 %v699_v16, 0.0 }
 0x212   : > { %v715_v22 = vmax.f32 %v691_v18, 0.0 }
 0x213   : > { %v978_v23 = vpack.c.bf16 %v717_v20, %v716_v19 }
 0x214   : > { %v973_v24 = vpack.c.bf16 %v715_v22, %v714_v21 }
 0x215   : > { %986 = vst [vmem:[%s1299_s27 + $0x38] sm:$0xff] %v978_v23  }
 0x216   : > { %985 = vst [vmem:[%s1299_s27 + $0x30] sm:$0xff] %v973_v24  }
 0x217 PF: > { %s14_s15 = sadd.s32 1, %s1161_s15  }
 0x218   : > { %p11_p4 = scmp.ge.s32.totalorder %s14_s15, 4  }
 0x21a   :  { %13 = sbr.rel (!%p11_p4) target bundleno = 1 (0x1), region = 66 }

</bundles_post_ra>
